<compile_context>
chip_gen: v5e
topology: v5e:2x2
jax: 0.10.0
libtpu: 0.0.40
codegen_flags: <defaults>
</compile_context>

<pallas_src>
import jax
import jax.numpy as jnp
from jax.experimental import pallas as pl
from jax.experimental.pallas import tpu as pltpu

TEMP = 0.66                    # parity with the PyTorch module (not used numerically)
Z_PRIVATE = 50
Z_SHARED = 10
Z_DIM = Z_PRIVATE + Z_SHARED   # 60
HIDDEN = 200
OUT = 400

HID_PAD = 256                  # 200 -> 256 (lane-dense MXU tiles)
OUT_PAD = 512                  # 400 -> 512
LANES = 128
TILE_M_MAX = 256


def _round_up(x, m):
    return (x + m - 1) // m * m


def _decoder_kernel(z_ref, img_ref,
                    w1_ref, w2_ref, w3_ref, w4_ref, w5_ref, w6_ref, w7_ref,
                    recon_ref, lsum_ref):
    # z_ref: (tile_m, 60) bf16; weights: bf16, zero-padded to lane-dense shapes.
    # Matmuls run on the MXU in bf16 with f32 accumulation; ReLU and loss in f32.
    def lin_relu(x_bf16, w_ref):
        y = jnp.dot(x_bf16, w_ref[...], preferred_element_type=jnp.float32)
        return jnp.maximum(y, 0.0)

    h = lin_relu(z_ref[...], w1_ref)                             # (tile_m, 256) f32
    for w_ref in (w2_ref, w3_ref, w4_ref, w5_ref, w6_ref):
        h = lin_relu(h.astype(jnp.bfloat16), w_ref)
    recon = jnp.dot(h.astype(jnp.bfloat16), w7_ref[...],
                    preferred_element_type=jnp.float32)          # (tile_m, 512) f32
    recon_ref[...] = recon

    # Sum-of-squares loss, reduced lane-chunk-wise (pure VPU adds) so the output
    # stays lane-dense; the final 128-lane reduction is done in the wrapper.
    diff = img_ref[...] - recon
    d2 = diff * diff
    acc = d2[:, 0:LANES]
    for c in range(1, OUT_PAD // LANES):
        acc = acc + d2[:, c * LANES:(c + 1) * LANES]
    lsum_ref[...] = acc                                          # (tile_m, 128)


@jax.jit
def _mlp_mse_stacked(z_all, images_all, *weights_padded):
    """z_all: (M, 60), images_all: (M, 400); weights pre-padded bf16 (in, out)."""
    M = z_all.shape[0]
    tile_m = min(TILE_M_MAX, _round_up(max(M, 1), 16))
    m_pad = _round_up(M, tile_m)
    n_tiles = m_pad // tile_m

    z_p = jnp.pad(z_all.astype(jnp.bfloat16), ((0, m_pad - M), (0, 0)))
    img_p = jnp.pad(images_all.astype(jnp.float32),
                    ((0, m_pad - M), (0, OUT_PAD - OUT)))

    in_specs = ([pl.BlockSpec((tile_m, Z_DIM), lambda i: (i, 0)),
                 pl.BlockSpec((tile_m, OUT_PAD), lambda i: (i, 0))]
                + [pl.BlockSpec(w.shape, lambda i: (0, 0))    # weights stay VMEM-resident
                   for w in weights_padded])

    recon_p, lsum_p = pl.pallas_call(
        _decoder_kernel,
        out_shape=(jax.ShapeDtypeStruct((m_pad, OUT_PAD), jnp.float32),
                   jax.ShapeDtypeStruct((m_pad, LANES), jnp.float32)),
        grid=(n_tiles,),
        in_specs=in_specs,
        out_specs=(pl.BlockSpec((tile_m, OUT_PAD), lambda i: (i, 0)),
                   pl.BlockSpec((tile_m, LANES), lambda i: (i, 0))),
        compiler_params=pltpu.CompilerParams(
            dimension_semantics=("parallel",)),
    )(z_p, img_p, *weights_padded)

    recon = recon_p[:M, :OUT]
    loss = jnp.sum(lsum_p[:M], axis=-1)
    return recon, loss


def prepare_decoder_weights(weights):
    """Zero-pad (in, out) weights to lane-dense shapes and cast to bf16 ONCE."""
    def pad(w, rows, cols):
        w = jnp.asarray(w, jnp.float32)
        return jnp.pad(w, ((0, rows - w.shape[0]),
                           (0, cols - w.shape[1]))).astype(jnp.bfloat16)
    w1, w2, w3, w4, w5, w6, w7 = weights
    return (pad(w1, Z_DIM, HID_PAD),
            pad(w2, HID_PAD, HID_PAD), pad(w3, HID_PAD, HID_PAD),
            pad(w4, HID_PAD, HID_PAD), pad(w5, HID_PAD, HID_PAD),
            pad(w6, HID_PAD, HID_PAD),
            pad(w7, HID_PAD, OUT_PAD))


def decoder_a_forward_all_shared(images, z_private, shared_dict, weights_padded):
    """Mirrors the python loop over shared.keys() in the PyTorch forward, but runs
    all shared keys in a SINGLE pallas_call (keys stacked along the batch axis) so
    weights are transferred once and the MXU sees a larger M dimension."""
    # TODO(synk): probtorch.Trace / prior Normal log-prob bookkeeping is python glue,
    # not a numeric kernel; only recon + sum-of-squares loss per key are computed.
    names = list(shared_dict.keys())
    B = z_private.shape[0]
    z_all = jnp.concatenate(
        [jnp.concatenate([z_private, shared_dict[n]], axis=-1) for n in names], axis=0)
    images_all = jnp.tile(images, (len(names), 1))
    recon_all, loss_all = _mlp_mse_stacked(z_all, images_all, *weights_padded)
    out = {}
    for k, n in enumerate(names):
        out['images1_' + n] = (recon_all[k * B:(k + 1) * B],
                               loss_all[k * B:(k + 1) * B])
    return out


def decoder_a_forward(images, z_private, z_shared, weights_padded):
    """Single-key convenience path: returns (recon (B,400), loss (B,))."""
    z = jnp.concatenate([z_private, z_shared], axis=-1)
    return _mlp_mse_stacked(z, images, *weights_padded)


def make_decoder_weights(seed=0):
    """Deterministic kaiming-normal (fan_in, relu gain) init, bias-free Linears."""
    dims = [(Z_DIM, HIDDEN)] + [(HIDDEN, HIDDEN)] * 5 + [(HIDDEN, OUT)]
    key = jax.random.PRNGKey(seed)
    weights = []
    for (fan_in, fan_out) in dims:
        key, sub = jax.random.split(key)
        std = (2.0 / fan_in) ** 0.5
        # Stored as (in, out); equivalent to torch's (out, in) weight transposed.
        weights.append(std * jax.random.normal(sub, (fan_in, fan_out), dtype=jnp.float32))
    return weights


def _reference_f32(images, z_private, z_shared, weights):
    z = jnp.concatenate([z_private, z_shared], axis=-1)
    h = z
    for w in weights[:-1]:
        h = jnp.maximum(h @ w, 0.0)
    recon = h @ weights[-1]
    loss = jnp.sum((images - recon) ** 2, axis=-1)
    return recon, loss


def _reference_bf16(images, z_private, z_shared, weights_padded):
    # Precision-matched reference (same bf16 weights / bf16 activation casts,
    # f32 accumulation) for a tight correctness check of the kernel itself.
    z = jnp.concatenate([z_private, z_shared], axis=-1).astype(jnp.bfloat16)
    h = z
    for w in weights_padded[:-1]:
        h = jnp.maximum(jnp.dot(h, w, preferred_element_type=jnp.float32),
                        0.0).astype(jnp.bfloat16)
    recon = jnp.dot(h, weights_padded[-1], preferred_element_type=jnp.float32)[:, :OUT]
    loss = jnp.sum((images.astype(jnp.float32) - recon) ** 2, axis=-1)
    return recon, loss


if __name__ == "__main__":
    key = jax.random.PRNGKey(0)
    kz, ks1, ks2, ki = jax.random.split(key, 4)

    B = 8  # small batch
    z_private = jax.random.normal(kz, (B, Z_PRIVATE), dtype=jnp.float32)
    shared = {
        "sharedA": jax.random.normal(ks1, (B, Z_SHARED), dtype=jnp.float32),
        "poe": jax.random.normal(ks2, (B, Z_SHARED), dtype=jnp.float32),
    }
    images = jax.random.uniform(ki, (B, OUT), dtype=jnp.float32)

    weights = make_decoder_weights(seed=0)
    weights_padded = prepare_decoder_weights(weights)   # pad + bf16 cast once

    outs = decoder_a_forward_all_shared(images, z_private, shared, weights_padded)
    jax.block_until_ready(outs)

    for name, z_shared in shared.items():
        recon, loss = outs['images1_' + name]
        assert recon.shape == (B, OUT) and loss.shape == (B,)

        # Tight check vs. a precision-matched (bf16 weights/activations) reference.
        recon_q, loss_q = _reference_bf16(images, z_private, z_shared, weights_padded)
        assert jnp.allclose(recon, recon_q, atol=5e-3, rtol=5e-3), name
        assert jnp.allclose(loss, loss_q, atol=5e-2, rtol=5e-3), name

        # Loose semantic check vs. the full-f32 PyTorch-equivalent reference.
        recon_f, loss_f = _reference_f32(images, z_private, z_shared, weights)
        assert jnp.allclose(recon, recon_f, atol=1e-1, rtol=1e-1), name
        assert jnp.allclose(loss, loss_f, atol=1.0, rtol=5e-2), name

    print("KERNEL_OK")
</pallas_src>

<mosaic_0001>
module attributes {stable_mosaic.version = 11 : i64} {
  func.func @_decoder_kernel(%arg0: i32, %arg1: memref<16x60xbf16, #tpu.memory_space<vmem>>, %arg2: memref<16x512xf32, #tpu.memory_space<vmem>>, %arg3: memref<60x256xbf16, #tpu.memory_space<vmem>>, %arg4: memref<256x256xbf16, #tpu.memory_space<vmem>>, %arg5: memref<256x256xbf16, #tpu.memory_space<vmem>>, %arg6: memref<256x256xbf16, #tpu.memory_space<vmem>>, %arg7: memref<256x256xbf16, #tpu.memory_space<vmem>>, %arg8: memref<256x256xbf16, #tpu.memory_space<vmem>>, %arg9: memref<256x512xbf16, #tpu.memory_space<vmem>>, %arg10: memref<16x512xf32, #tpu.memory_space<vmem>>, %arg11: memref<16x128xf32, #tpu.memory_space<vmem>>) attributes {dimension_semantics = [#tpu.dimension_semantics<parallel>], iteration_bounds = array<i64: 1>, scalar_prefetch = 0 : i64, scratch_operands = 0 : i64, tpu.core_type = #tpu.core_type<tc>, window_params = [{transform_indices = @transform_0, window_bounds = array<i64: 16, 60>}, {transform_indices = @transform_1, window_bounds = array<i64: 16, 512>}, {pipeline_mode = #tpu.pipeline_mode<synchronous>, transform_indices = @transform_2, window_bounds = array<i64: 60, 256>}, {pipeline_mode = #tpu.pipeline_mode<synchronous>, transform_indices = @transform_3, window_bounds = array<i64: 256, 256>}, {pipeline_mode = #tpu.pipeline_mode<synchronous>, transform_indices = @transform_4, window_bounds = array<i64: 256, 256>}, {pipeline_mode = #tpu.pipeline_mode<synchronous>, transform_indices = @transform_5, window_bounds = array<i64: 256, 256>}, {pipeline_mode = #tpu.pipeline_mode<synchronous>, transform_indices = @transform_6, window_bounds = array<i64: 256, 256>}, {pipeline_mode = #tpu.pipeline_mode<synchronous>, transform_indices = @transform_7, window_bounds = array<i64: 256, 256>}, {pipeline_mode = #tpu.pipeline_mode<synchronous>, transform_indices = @transform_8, window_bounds = array<i64: 256, 512>}, {transform_indices = @transform_9, window_bounds = array<i64: 16, 512>}, {transform_indices = @transform_10, window_bounds = array<i64: 16, 128>}]} {
    %c0 = arith.constant 0 : index
    %c0_0 = arith.constant 0 : index
    %0 = vector.load %arg1[%c0, %c0_0] : memref<16x60xbf16, #tpu.memory_space<vmem>>, vector<16x60xbf16>
    %c0_1 = arith.constant 0 : index
    %c0_2 = arith.constant 0 : index
    %1 = vector.load %arg3[%c0_1, %c0_2] : memref<60x256xbf16, #tpu.memory_space<vmem>>, vector<60x256xbf16>
    %cst = arith.constant dense<0.000000e+00> : vector<16x256xf32>
    %2 = tpu.matmul %0, %1, %cst {dimension_numbers = #tpu.dot_dimension_numbers<[1], [0], [0], [1], [0, 0, 1, 1], [], []>} : vector<16x60xbf16>, vector<60x256xbf16>, vector<16x256xf32> -> vector<16x256xf32>
    %cst_3 = arith.constant 0.000000e+00 : f32
    %3 = vector.broadcast %cst_3 : f32 to vector<16x256xf32>
    %4 = arith.maximumf %2, %3 : vector<16x256xf32>
    %5 = arith.truncf %4 : vector<16x256xf32> to vector<16x256xbf16>
    %c0_4 = arith.constant 0 : index
    %c0_5 = arith.constant 0 : index
    %6 = vector.load %arg4[%c0_4, %c0_5] : memref<256x256xbf16, #tpu.memory_space<vmem>>, vector<256x256xbf16>
    %cst_6 = arith.constant dense<0.000000e+00> : vector<16x256xf32>
    %7 = tpu.matmul %5, %6, %cst_6 {dimension_numbers = #tpu.dot_dimension_numbers<[1], [0], [0], [1], [0, 0, 1, 1], [], []>} : vector<16x256xbf16>, vector<256x256xbf16>, vector<16x256xf32> -> vector<16x256xf32>
    %cst_7 = arith.constant 0.000000e+00 : f32
    %8 = vector.broadcast %cst_7 : f32 to vector<16x256xf32>
    %9 = arith.maximumf %7, %8 : vector<16x256xf32>
    %10 = arith.truncf %9 : vector<16x256xf32> to vector<16x256xbf16>
    %c0_8 = arith.constant 0 : index
    %c0_9 = arith.constant 0 : index
    %11 = vector.load %arg5[%c0_8, %c0_9] : memref<256x256xbf16, #tpu.memory_space<vmem>>, vector<256x256xbf16>
    %cst_10 = arith.constant dense<0.000000e+00> : vector<16x256xf32>
    %12 = tpu.matmul %10, %11, %cst_10 {dimension_numbers = #tpu.dot_dimension_numbers<[1], [0], [0], [1], [0, 0, 1, 1], [], []>} : vector<16x256xbf16>, vector<256x256xbf16>, vector<16x256xf32> -> vector<16x256xf32>
    %cst_11 = arith.constant 0.000000e+00 : f32
    %13 = vector.broadcast %cst_11 : f32 to vector<16x256xf32>
    %14 = arith.maximumf %12, %13 : vector<16x256xf32>
    %15 = arith.truncf %14 : vector<16x256xf32> to vector<16x256xbf16>
    %c0_12 = arith.constant 0 : index
    %c0_13 = arith.constant 0 : index
    %16 = vector.load %arg6[%c0_12, %c0_13] : memref<256x256xbf16, #tpu.memory_space<vmem>>, vector<256x256xbf16>
    %cst_14 = arith.constant dense<0.000000e+00> : vector<16x256xf32>
    %17 = tpu.matmul %15, %16, %cst_14 {dimension_numbers = #tpu.dot_dimension_numbers<[1], [0], [0], [1], [0, 0, 1, 1], [], []>} : vector<16x256xbf16>, vector<256x256xbf16>, vector<16x256xf32> -> vector<16x256xf32>
    %cst_15 = arith.constant 0.000000e+00 : f32
    %18 = vector.broadcast %cst_15 : f32 to vector<16x256xf32>
    %19 = arith.maximumf %17, %18 : vector<16x256xf32>
    %20 = arith.truncf %19 : vector<16x256xf32> to vector<16x256xbf16>
    %c0_16 = arith.constant 0 : index
    %c0_17 = arith.constant 0 : index
    %21 = vector.load %arg7[%c0_16, %c0_17] : memref<256x256xbf16, #tpu.memory_space<vmem>>, vector<256x256xbf16>
    %cst_18 = arith.constant dense<0.000000e+00> : vector<16x256xf32>
    %22 = tpu.matmul %20, %21, %cst_18 {dimension_numbers = #tpu.dot_dimension_numbers<[1], [0], [0], [1], [0, 0, 1, 1], [], []>} : vector<16x256xbf16>, vector<256x256xbf16>, vector<16x256xf32> -> vector<16x256xf32>
    %cst_19 = arith.constant 0.000000e+00 : f32
    %23 = vector.broadcast %cst_19 : f32 to vector<16x256xf32>
    %24 = arith.maximumf %22, %23 : vector<16x256xf32>
    %25 = arith.truncf %24 : vector<16x256xf32> to vector<16x256xbf16>
    %c0_20 = arith.constant 0 : index
    %c0_21 = arith.constant 0 : index
    %26 = vector.load %arg8[%c0_20, %c0_21] : memref<256x256xbf16, #tpu.memory_space<vmem>>, vector<256x256xbf16>
    %cst_22 = arith.constant dense<0.000000e+00> : vector<16x256xf32>
    %27 = tpu.matmul %25, %26, %cst_22 {dimension_numbers = #tpu.dot_dimension_numbers<[1], [0], [0], [1], [0, 0, 1, 1], [], []>} : vector<16x256xbf16>, vector<256x256xbf16>, vector<16x256xf32> -> vector<16x256xf32>
    %cst_23 = arith.constant 0.000000e+00 : f32
    %28 = vector.broadcast %cst_23 : f32 to vector<16x256xf32>
    %29 = arith.maximumf %27, %28 : vector<16x256xf32>
    %30 = arith.truncf %29 : vector<16x256xf32> to vector<16x256xbf16>
    %c0_24 = arith.constant 0 : index
    %c0_25 = arith.constant 0 : index
    %31 = vector.load %arg9[%c0_24, %c0_25] : memref<256x512xbf16, #tpu.memory_space<vmem>>, vector<256x512xbf16>
    %cst_26 = arith.constant dense<0.000000e+00> : vector<16x512xf32>
    %32 = tpu.matmul %30, %31, %cst_26 {dimension_numbers = #tpu.dot_dimension_numbers<[1], [0], [0], [1], [0, 0, 1, 1], [], []>} : vector<16x256xbf16>, vector<256x512xbf16>, vector<16x512xf32> -> vector<16x512xf32>
    %c0_27 = arith.constant 0 : index
    %c0_28 = arith.constant 0 : index
    %33 = vector.load %arg10[%c0_27, %c0_28] : memref<16x512xf32, #tpu.memory_space<vmem>>, vector<16x512xf32>
    tpu.vector_store %arg10[%c0_27, %c0_28], %32 {strides = array<i32>} : memref<16x512xf32, #tpu.memory_space<vmem>>, vector<16x512xf32>,
    %c0_29 = arith.constant 0 : index
    %c0_30 = arith.constant 0 : index
    %34 = vector.load %arg2[%c0_29, %c0_30] : memref<16x512xf32, #tpu.memory_space<vmem>>, vector<16x512xf32>
    %35 = arith.subf %34, %32 : vector<16x512xf32>
    %36 = arith.mulf %35, %35 : vector<16x512xf32>
    %37 = vector.extract_strided_slice %36 {offsets = [0, 0], sizes = [16, 128], strides = [1, 1]} : vector<16x512xf32> to vector<16x128xf32>
    %38 = vector.extract_strided_slice %36 {offsets = [0, 128], sizes = [16, 128], strides = [1, 1]} : vector<16x512xf32> to vector<16x128xf32>
    %39 = arith.addf %37, %38 : vector<16x128xf32>
    %40 = vector.extract_strided_slice %36 {offsets = [0, 256], sizes = [16, 128], strides = [1, 1]} : vector<16x512xf32> to vector<16x128xf32>
    %41 = arith.addf %39, %40 : vector<16x128xf32>
    %42 = vector.extract_strided_slice %36 {offsets = [0, 384], sizes = [16, 128], strides = [1, 1]} : vector<16x512xf32> to vector<16x128xf32>
    %43 = arith.addf %41, %42 : vector<16x128xf32>
    %c0_31 = arith.constant 0 : index
    %c0_32 = arith.constant 0 : index
    %44 = vector.load %arg11[%c0_31, %c0_32] : memref<16x128xf32, #tpu.memory_space<vmem>>, vector<16x128xf32>
    tpu.vector_store %arg11[%c0_31, %c0_32], %43 {strides = array<i32>} : memref<16x128xf32, #tpu.memory_space<vmem>>, vector<16x128xf32>,
    return
  }
  func.func @transform_0(%arg0: i32) -> (i32, i32) {
    %c0_i32 = arith.constant 0 : i32
    %c0_i32_0 = arith.constant 0 : i32
    return %arg0, %c0_i32 : i32, i32
  }
  func.func @transform_1(%arg0: i32) -> (i32, i32) {
    %c0_i32 = arith.constant 0 : i32
    %c0_i32_0 = arith.constant 0 : i32
    return %arg0, %c0_i32 : i32, i32
  }
  func.func @transform_2(%arg0: i32) -> (i32, i32) {
    %c0_i32 = arith.constant 0 : i32
    %c0_i32_0 = arith.constant 0 : i32
    %c0_i32_1 = arith.constant 0 : i32
    return %c0_i32, %c0_i32_0 : i32, i32
  }
  func.func @transform_3(%arg0: i32) -> (i32, i32) {
    %c0_i32 = arith.constant 0 : i32
    %c0_i32_0 = arith.constant 0 : i32
    %c0_i32_1 = arith.constant 0 : i32
    return %c0_i32, %c0_i32_0 : i32, i32
  }
  func.func @transform_4(%arg0: i32) -> (i32, i32) {
    %c0_i32 = arith.constant 0 : i32
    %c0_i32_0 = arith.constant 0 : i32
    %c0_i32_1 = arith.constant 0 : i32
    return %c0_i32, %c0_i32_0 : i32, i32
  }
  func.func @transform_5(%arg0: i32) -> (i32, i32) {
    %c0_i32 = arith.constant 0 : i32
    %c0_i32_0 = arith.constant 0 : i32
    %c0_i32_1 = arith.constant 0 : i32
    return %c0_i32, %c0_i32_0 : i32, i32
  }
  func.func @transform_6(%arg0: i32) -> (i32, i32) {
    %c0_i32 = arith.constant 0 : i32
    %c0_i32_0 = arith.constant 0 : i32
    %c0_i32_1 = arith.constant 0 : i32
    return %c0_i32, %c0_i32_0 : i32, i32
  }
  func.func @transform_7(%arg0: i32) -> (i32, i32) {
    %c0_i32 = arith.constant 0 : i32
    %c0_i32_0 = arith.constant 0 : i32
    %c0_i32_1 = arith.constant 0 : i32
    return %c0_i32, %c0_i32_0 : i32, i32
  }
  func.func @transform_8(%arg0: i32) -> (i32, i32) {
    %c0_i32 = arith.constant 0 : i32
    %c0_i32_0 = arith.constant 0 : i32
    %c0_i32_1 = arith.constant 0 : i32
    return %c0_i32, %c0_i32_0 : i32, i32
  }
  func.func @transform_9(%arg0: i32) -> (i32, i32) {
    %c0_i32 = arith.constant 0 : i32
    %c0_i32_0 = arith.constant 0 : i32
    return %arg0, %c0_i32 : i32, i32
  }
  func.func @transform_10(%arg0: i32) -> (i32, i32) {
    %c0_i32 = arith.constant 0 : i32
    %c0_i32_0 = arith.constant 0 : i32
    return %arg0, %c0_i32 : i32, i32
  }
}

</mosaic_0001>

<bundles_post_ra>
// kernel: _mlp_mse_stacked.1
= control target key start
LH: loop header
LB: loop body
LE: loop exit
PB: predicated region body
PF: predicated region fallthrough
CT: control target
= control target key end

     0   :  { %16 = vsyncpa [#allocation3], 0  ;;  %s3605_s0 = inlined_call_operand.vmem [shape: bf16[16,60], index: 0, kind: input, shape index: {}]   ;;  %s3606_s1 = inlined_call_operand.vmem [shape: f32[16,512], index: 1, kind: input, shape index: {}]   ;;  %s3607_s2 = inlined_call_operand.vmem [shape: bf16[60,256], index: 2, kind: input, shape index: {}]   ;;  %s3608_s3 = inlined_call_operand.hbm [shape: bf16[256,256], index: 3, kind: input, shape index: {}]   ;;  %s3609_s4 = inlined_call_operand.hbm [shape: bf16[256,256], index: 4, kind: input, shape index: {}]   ;;  %s3610_s5 = inlined_call_operand.hbm [shape: bf16[256,256], index: 5, kind: input, shape index: {}]   ;;  %s3611_s6 = inlined_call_operand.hbm [shape: bf16[256,256], index: 6, kind: input, shape index: {}]   ;;  %s3612_s7 = inlined_call_operand.hbm [shape: bf16[256,256], index: 7, kind: input, shape index: {}]   ;;  %s3613_s8 = inlined_call_operand.hbm [shape: bf16[256,512], index: 8, kind: input, shape index: {}]   ;;  %s3614_s9 = inlined_call_operand.hbm [shape: f32[16,512], index: 9, kind: output, shape index: {0}]   ;;  %s3615_s10 = inlined_call_operand.vmem [shape: f32[16,128], index: 10, kind: output, shape index: {1}]  }
   0x1   :  { %17 = vsyncpa [#allocation6], 0 }
   0x2   :  { %18 = vsyncpa [#allocation9], 0 }
   0x3   :  { %19 = vsyncpa [#allocation12], 0 }
   0x4   :  { %20 = vsyncpa [#allocation4], 0  ;;  %s44_s15 = sshll.u32 %s3609_s4, 4  ;;  %s3418_s16 = smov [#allocation5]   ;;  %s45_s15 = int_to_ptr.hbm [resolvable:$true] %s44_s15 }
   0x5   :  { %s46_s17 = sshll.u32 %s3418_s16, 4  ;;  %s70_s20 = sshll.u32 %s3611_s6, 4  ;;  %s47_s17 = int_to_ptr.vmem [resolvable:$true] %s46_s17  ;;  %s71_s20 = int_to_ptr.hbm [resolvable:$true] %s70_s20 }
   0x6   :  { %s3419_s21 = smov 128   ;;  %s3420_s22 = smov 8  }
   0x7   :  { %52 = dma.hbm_to_vmem [thread:$0]  %s45_s15, 4096, %s47_s17, [#allocation6], %s3419_s21, %s3419_s21, %s3420_s22  }
   0x8   :  { %s3421_s23 = smov [#allocation8]   ;;  %s31_s4 = sshll.u32 %s3608_s3, 4  ;;  %s32_s4 = int_to_ptr.hbm [resolvable:$true] %s31_s4 }
   0x9   :  { %s72_s24 = sshll.u32 %s3421_s23, 4  ;;  %s57_s28 = sshll.u32 %s3610_s5, 4  ;;  %s73_s24 = int_to_ptr.vmem [resolvable:$true] %s72_s24  ;;  %s58_s28 = int_to_ptr.hbm [resolvable:$true] %s57_s28 }
   0xa   :  { %78 = dma.hbm_to_vmem [thread:$0]  %s71_s20, 4096, %s73_s24, [#allocation9], %s3419_s21, %s3419_s21, %s3420_s22  }
   0xb   :  { %s3422_s29 = smov [#allocation2]   ;;  %s3423_s11 = smov [#allocation7]  }
   0xc   :  { %s33_s30 = sshll.u32 %s3422_s29, 4  ;;  %s59_s3 = sshll.u32 %s3423_s11, 4  ;;  %s34_s30 = int_to_ptr.vmem [resolvable:$true] %s33_s30  ;;  %s60_s3 = int_to_ptr.vmem [resolvable:$true] %s59_s3 }
   0xd   :  { %39 = dma.hbm_to_vmem [thread:$0]  %s32_s4, 4096, %s34_s30, [#allocation3], %s3419_s21, %s3419_s21, %s3420_s22  }
   0xe   :  { %s83_s14 = sshll.u32 %s3612_s7, 4  ;;  %s96_s16 = sshll.u32 %s3613_s8, 4  ;;  %s84_s14 = int_to_ptr.hbm [resolvable:$true] %s83_s14  ;;  %s97_s16 = int_to_ptr.hbm [resolvable:$true] %s96_s16 }
   0xf   :  { %65 = dma.hbm_to_vmem [thread:$0]  %s58_s28, 4096, %s60_s3, [#allocation6], %s3419_s21, %s3419_s21, %s3420_s22  }
  0x10   :  { %s3424_s17 = smov [#allocation10]   ;;  %s3425_s19 = smov [#allocation11]  }
  0x11   :  { %s85_s18 = sshll.u32 %s3424_s17, 4  ;;  %s98_s7 = sshll.u32 %s3425_s19, 4  ;;  %s86_s18 = int_to_ptr.vmem [resolvable:$true] %s85_s18  ;;  %s99_s7 = int_to_ptr.vmem [resolvable:$true] %s98_s7 }
  0x12   :  { %91 = dma.hbm_to_vmem [thread:$0]  %s84_s14, 4096, %s86_s18, [#allocation9], %s3419_s21, %s3419_s21, %s3420_s22  }
  0x13   :  { %s3426_s20 = smov 256   ;;  %s3427_s23 = smov 16  }
  0x14   :  { %104 = dma.hbm_to_vmem [thread:$0]  %s97_s16, 8192, %s99_s7, [#allocation12], %s3426_s20, %s3426_s20, %s3427_s23  }
  0x15   :  { %3408 = dma.done.wait [#allocation3], 4096  }
  0x16   :  { %3409 = vsyncadd [#allocation3], 4294963200 }
  0x17   :  { %3410 = dma.done.wait [#allocation6], 8192  }
  0x18   :  { %3411 = vsyncadd [#allocation6], 4294959104 }
  0x19   :  { %3412 = dma.done.wait [#allocation9], 8192  }
  0x1a   :  { %3413 = vsyncadd [#allocation9], 4294959104 }
  0x1b   :  { %3414 = dma.done.wait [#allocation12], 8192  }
  0x1c   :  { %3415 = vsyncadd [#allocation12], 4294959104  ;;  %vm187_vm0 = vcmask 1045504   ;;  %v2090_v0 = vld [vmem:[%s3607_s2 + $0x30] sm:$0xf]  ;;  %v2994_v46 = vld [vmem:[%s3605_s0] sm:$0xff] }
  0x1d   :  { %v3002_v1 = vld [vmem:[%s3607_s2 + $0x34] sm:$0x30]  ;;  %v3001_v2 = vld [vmem:[%s3607_s2 + $0x34] sm:$0xf]  ;;  %v2092_v4 = vld [vmem:[%s3607_s2 + $0x38] sm:$0x30] }
  0x1e   :  { %v2091_v3 = vor.u32 %v3002_v1, %v2090_v0  ;;  %v2082_v5 = vld [vmem:[%s3607_s2 + $0x20] sm:$0xf]  ;;  %v3000_v6 = vld [vmem:[%s3607_s2 + $0x24] sm:$0xf0]  ;;  %v2095_v7 = vor.u32 %v3001_v2, %v2092_v4  ;;  %v2999_v8 = vld [vmem:[%s3607_s2 + $0x24] sm:$0xf] }
  0x1f   :  { %v2084_v9 = vld [vmem:[%s3607_s2 + $0x28] sm:$0xf0]  ;;  %v2083_v12 = vor.u32 %v3000_v6, %v2082_v5  ;;  %v2074_v13 = vld [vmem:[%s3607_s2 + $0x10] sm:$0xf]  ;;  %v2998_v15 = vld [vmem:[%s3607_s2 + $0x14] sm:$0xf0] }
  0x20   :  { %v189_v10 = vsel %vm187_vm0, %v2091_v3, 0  ;;  %v192_v11 = vsel %vm187_vm0, %v2095_v7, 0  ;;  %v2087_v14 = vor.u32 %v2999_v8, %v2084_v9  ;;  %v2997_v16 = vld [vmem:[%s3607_s2 + $0x14] sm:$0xf]  ;;  %v2076_v17 = vld [vmem:[%s3607_s2 + $0x18] sm:$0xf0]  ;;  %v2075_v25 = vor.u32 %v2998_v15, %v2074_v13 }
  0x21   :  { %198 = vmatpush.bf16.msra.mxu0 %v189_v10  ;;  %212 = vmatpush.bf16.msra.mxu1 %v192_v11  ;;  %v2156_v18 = vld [vmem:[#allocation2 + $0x70] sm:$0xf]  ;;  %v3018_v19 = vld [vmem:[#allocation2 + $0x74] sm:$0xf0]  ;;  %v2066_v21 = vld [vmem:[%s3607_s2] sm:$0xf]  ;;  %v2079_v30 = vor.u32 %v2997_v16, %v2076_v17 }
  0x22   :  { %v2220_v20 = vld [vmem:[#allocation2 + $0xf0] sm:$0xf]  ;;  %v2996_v22 = vld [vmem:[%s3607_s2 + $0x4] sm:$0xf0]  ;;  %v2157_v23 = vor.u32 %v3018_v19, %v2156_v18  ;;  %v3034_v24 = vld [vmem:[#allocation2 + $0xf4] sm:$0xf0] }
  0x23   :  { %v2995_v26 = vld [vmem:[%s3607_s2 + $0x4] sm:$0xf]  ;;  %v2068_v27 = vld [vmem:[%s3607_s2 + $0x8] sm:$0xf0]  ;;  %v2221_v28 = vor.u32 %v3034_v24, %v2220_v20  ;;  %v2148_v29 = vld [vmem:[#allocation2 + $0x60] sm:$0xf]  ;;  %v2067_v42 = vor.u32 %v2996_v22, %v2066_v21 }
  0x24   :  { %420 = vmatpush.bf16.msra.mxu2 %v2157_v23  ;;  %v3016_v31 = vld [vmem:[#allocation2 + $0x64] sm:$0xf0]  ;;  %v2212_v32 = vld [vmem:[#allocation2 + $0xe0] sm:$0xf]  ;;  %v3017_v34 = vld [vmem:[#allocation2 + $0x74] sm:$0xf]  ;;  %v2071_v45 = vor.u32 %v2995_v26, %v2068_v27 }
  0x25   :  { %199 = vmatpush.bf16.msra.mxu0 %v2083_v12  ;;  %213 = vmatpush.bf16.msra.mxu1 %v2087_v14  ;;  %v3032_v33 = vld [vmem:[#allocation2 + $0xe4] sm:$0xf0]  ;;  %v2158_v35 = vld [vmem:[#allocation2 + $0x78] sm:$0xf0]  ;;  %v3033_v36 = vld [vmem:[#allocation2 + $0xf4] sm:$0xf]  ;;  %v2149_v37 = vor.u32 %v3016_v31, %v2148_v29 }
  0x26   :  { %434 = vmatpush.bf16.msra.mxu3 %v2221_v28  ;;  %v2213_v38 = vor.u32 %v3032_v33, %v2212_v32  ;;  %v2222_v39 = vld [vmem:[#allocation2 + $0xf8] sm:$0xf0]  ;;  %v2140_v40 = vld [vmem:[#allocation2 + $0x50] sm:$0xf]  ;;  %v3014_v41 = vld [vmem:[#allocation2 + $0x54] sm:$0xf0]  ;;  %v2161_v47 = vor.u32 %v3017_v34, %v2158_v35 }
  0x27   :  { %v2204_v43 = vld [vmem:[#allocation2 + $0xd0] sm:$0xf]  ;;  %v3030_v44 = vld [vmem:[#allocation2 + $0xd4] sm:$0xf0]  ;;  %v2225_v48 = vor.u32 %v3033_v36, %v2222_v39  ;;  %v3015_v49 = vld [vmem:[#allocation2 + $0x64] sm:$0xf]  ;;  %v2141_v52 = vor.u32 %v3014_v41, %v2140_v40 }
  0x28   :  { %421 = vmatpush.bf16.msra.mxu2 %v2149_v37  ;;  %v2150_v50 = vld [vmem:[#allocation2 + $0x68] sm:$0xf0]  ;;  %v3031_v51 = vld [vmem:[#allocation2 + $0xe4] sm:$0xf]  ;;  %v2205_v54 = vor.u32 %v3030_v44, %v2204_v43  ;;  %v2132_v55 = vld [vmem:[#allocation2 + $0x40] sm:$0xf] }
  0x29   :  { %200 = vmatpush.bf16.msra.mxu0 %v2075_v25  ;;  %214 = vmatpush.bf16.msra.mxu1 %v2079_v30  ;;  %v2214_v53 = vld [vmem:[#allocation2 + $0xe8] sm:$0xf0]  ;;  %v3012_v56 = vld [vmem:[#allocation2 + $0x44] sm:$0xf0]  ;;  %vm183_vm1 = vcmask 490496   ;;  %v2153_v59 = vor.u32 %v3015_v49, %v2150_v50  ;;  %s3428_s15 = smov [#allocation13]  }
  0x2a   :  { %435 = vmatpush.bf16.msra.mxu3 %v2213_v38  ;;  %v2196_v57 = vld [vmem:[#allocation2 + $0xc0] sm:$0xf]  ;;  %v3028_v58 = vld [vmem:[#allocation2 + $0xc4] sm:$0xf0]  ;;  %v2217_v60 = vor.u32 %v3031_v51, %v2214_v53  ;;  %v3013_v61 = vld [vmem:[#allocation2 + $0x54] sm:$0xf]  ;;  %v2133_v0 = vor.u32 %v3012_v56, %v2132_v55 }
  0x2b   :  { %v2142_v62 = vld [vmem:[#allocation2 + $0x58] sm:$0xf0]  ;;  %v3029_v63 = vld [vmem:[#allocation2 + $0xd4] sm:$0xf]  ;;  %v2197_v2 = vor.u32 %v3028_v58, %v2196_v57  ;;  %v2124_v3 = vld [vmem:[#allocation2 + $0x30] sm:$0xf] }
  0x2c   :  { %422 = vmatpush.bf16.msra.mxu2 %v2141_v52  ;;  %v2206_v1 = vld [vmem:[#allocation2 + $0xd8] sm:$0xf0]  ;;  %v3010_v4 = vld [vmem:[#allocation2 + $0x34] sm:$0xf0]  ;;  %v2188_v5 = vld [vmem:[#allocation2 + $0xb0] sm:$0xf]  ;;  %v2145_v7 = vor.u32 %v3013_v61, %v2142_v62 }
  0x2d   :  { %201 = vmatpush.bf16.msra.mxu0 %v2067_v42  ;;  %215 = vmatpush.bf16.msra.mxu1 %v2071_v45  ;;  %v3026_v6 = vld [vmem:[#allocation2 + $0xb4] sm:$0xf0]  ;;  %v2209_v8 = vor.u32 %v3029_v63, %v2206_v1  ;;  %v3011_v9 = vld [vmem:[#allocation2 + $0x44] sm:$0xf]  ;;  %v2134_v10 = vld [vmem:[#allocation2 + $0x48] sm:$0xf0]  ;;  %v2125_v11 = vor.u32 %v3010_v4, %v2124_v3 }
  0x2e   :  { %436 = vmatpush.bf16.msra.mxu3 %v2205_v54  ;;  %v3027_v12 = vld [vmem:[#allocation2 + $0xc4] sm:$0xf]  ;;  %v2198_v13 = vld [vmem:[#allocation2 + $0xc8] sm:$0xf0]  ;;  %v2189_v14 = vor.u32 %v3026_v6, %v2188_v5  ;;  %v2137_v15 = vor.u32 %v3011_v9, %v2134_v10  ;;  %v3009_v17 = vld [vmem:[#allocation2 + $0x34] sm:$0xf] }
  0x2f   :  { %v2201_v16 = vor.u32 %v3027_v12, %v2198_v13  ;;  %v2126_v18 = vld [vmem:[#allocation2 + $0x38] sm:$0xf0]  ;;  %v3025_v19 = vld [vmem:[#allocation2 + $0xb4] sm:$0xf]  ;;  %v2116_v23 = vld [vmem:[#allocation2 + $0x20] sm:$0xf] }
  0x30   :  { %2096 = vmatmul.msk.bf16.vlgmr.msra.gmra.mxu0 %vm183_vm1, %v2994_v46  ;;  %2097 = vmatmul.msk.bf16.vlgmr.msra.gmra.mxu1 %vm183_vm1, %v2994_v46  ;;  %v2190_v20 = vld [vmem:[#allocation2 + $0xb8] sm:$0xf0]  ;;  %v2129_v21 = vor.u32 %v3009_v17, %v2126_v18  ;;  %v3008_v24 = vld [vmem:[#allocation2 + $0x24] sm:$0xf0]  ;;  %v2180_v25 = vld [vmem:[#allocation2 + $0xa0] sm:$0xf] }
  0x31   :  { %448 = vmatpush.bf16.msrb.mxu0 %v2161_v47  ;;  %462 = vmatpush.bf16.msrb.mxu1 %v2225_v48  ;;  %v2193_v22 = vor.u32 %v3025_v19, %v2190_v20  ;;  %v2117_v26 = vor.u32 %v3008_v24, %v2116_v23  ;;  %v3024_v27 = vld [vmem:[#allocation2 + $0xa4] sm:$0xf0]  ;;  %v3007_v28 = vld [vmem:[#allocation2 + $0x24] sm:$0xf]  ;;  %v2118_v29 = vld [vmem:[#allocation2 + $0x28] sm:$0xf0] }
  0x32   :  { %423 = vmatpush.bf16.msra.mxu2 %v2133_v0  ;;  %437 = vmatpush.bf16.msra.mxu3 %v2197_v2  ;;  %v2181_v30 = vor.u32 %v3024_v27, %v2180_v25  ;;  %v2121_v31 = vor.u32 %v3007_v28, %v2118_v29  ;;  %v3023_v32 = vld [vmem:[#allocation2 + $0xa4] sm:$0xf]  ;;  %v2182_v33 = vld [vmem:[#allocation2 + $0xa8] sm:$0xf0]  ;;  %v2108_v34 = vld [vmem:[#allocation2 + $0x10] sm:$0xf] }
  0x33   :  { %v2185_v35 = vor.u32 %v3023_v32, %v2182_v33  ;;  %v3006_v36 = vld [vmem:[#allocation2 + $0x14] sm:$0xf0]  ;;  %v2172_v37 = vld [vmem:[#allocation2 + $0x90] sm:$0xf]  ;;  %v3005_v41 = vld [vmem:[#allocation2 + $0x14] sm:$0xf] }
  0x34   :  { %v3022_v38 = vld [vmem:[#allocation2 + $0x94] sm:$0xf0]  ;;  %v2109_v39 = vor.u32 %v3006_v36, %v2108_v34  ;;  %v2110_v42 = vld [vmem:[#allocation2 + $0x18] sm:$0xf0]  ;;  %v3021_v43 = vld [vmem:[#allocation2 + $0x94] sm:$0xf] }
  0x35   :  { %449 = vmatpush.bf16.msrb.mxu0 %v2153_v59  ;;  %463 = vmatpush.bf16.msrb.mxu1 %v2217_v60  ;;  %v2173_v40 = vor.u32 %v3022_v38, %v2172_v37  ;;  %v2113_v44 = vor.u32 %v3005_v41, %v2110_v42  ;;  %v2174_v45 = vld [vmem:[#allocation2 + $0x98] sm:$0xf0]  ;;  %v2100_v47 = vld [vmem:[#allocation2] sm:$0xf]  ;;  %v3004_v48 = vld [vmem:[#allocation2 + $0x4] sm:$0xf0] }
  0x36   :  { %424 = vmatpush.bf16.msra.mxu2 %v2125_v11  ;;  %438 = vmatpush.bf16.msra.mxu3 %v2189_v14  ;;  %v2177_v46 = vor.u32 %v3021_v43, %v2174_v45  ;;  %v2164_v49 = vld [vmem:[#allocation2 + $0x80] sm:$0xf]  ;;  %v2101_v50 = vor.u32 %v3004_v48, %v2100_v47  ;;  %v3020_v51 = vld [vmem:[#allocation2 + $0x84] sm:$0xf0]  ;;  %v3003_v52 = vld [vmem:[#allocation2 + $0x4] sm:$0xf] }
  0x37   :  { %v2102_v53 = vld [vmem:[#allocation2 + $0x8] sm:$0xf0]  ;;  %v2165_v54 = vor.u32 %v3020_v51, %v2164_v49  ;;  %v3019_v56 = vld [vmem:[#allocation2 + $0x84] sm:$0xf]  ;;  %v2348_v59 = vld [vmem:[#allocation5 + $0xf0] sm:$0xf] }
  0x38   :  { %v2105_v55 = vor.u32 %v3003_v52, %v2102_v53  ;;  %v2166_v57 = vld [vmem:[#allocation2 + $0x88] sm:$0xf0]  ;;  %v3066_v60 = vld [vmem:[#allocation5 + $0xf4] sm:$0xf0]  ;;  %v3065_v61 = vld [vmem:[#allocation5 + $0xf4] sm:$0xf] }
  0x39   :  { %450 = vmatpush.bf16.msrb.mxu0 %v2145_v7  ;;  %464 = vmatpush.bf16.msrb.mxu1 %v2209_v8  ;;  %v2169_v58 = vor.u32 %v3019_v56, %v2166_v57  ;;  %v2349_v62 = vor.u32 %v3066_v60, %v2348_v59  ;;  %v2350_v63 = vld [vmem:[#allocation5 + $0xf8] sm:$0xf0]  ;;  %v2340_v0 = vld [vmem:[#allocation5 + $0xe0] sm:$0xf]  ;;  %v3064_v1 = vld [vmem:[#allocation5 + $0xe4] sm:$0xf0] }
  0x3a   :  { %425 = vmatpush.bf16.msra.mxu2 %v2117_v26  ;;  %439 = vmatpush.bf16.msra.mxu3 %v2181_v30  ;;  %v2353_v2 = vor.u32 %v3065_v61, %v2350_v63  ;;  %v3063_v3 = vld [vmem:[#allocation5 + $0xe4] sm:$0xf]  ;;  %v2342_v4 = vld [vmem:[#allocation5 + $0xe8] sm:$0xf0]  ;;  %v2284_v5 = vld [vmem:[#allocation5 + $0x70] sm:$0xf]  ;;  %v2341_v6 = vor.u32 %v3064_v1, %v2340_v0 }
  0x3b   :  { %v3050_v7 = vld [vmem:[#allocation5 + $0x74] sm:$0xf0]  ;;  %v3049_v8 = vld [vmem:[#allocation5 + $0x74] sm:$0xf]  ;;  %v2286_v9 = vld [vmem:[#allocation5 + $0x78] sm:$0xf0]  ;;  %v2345_v10 = vor.u32 %v3063_v3, %v2342_v4 }
  0x3c   :  { %v2285_v11 = vor.u32 %v3050_v7, %v2284_v5  ;;  %v2289_v12 = vor.u32 %v3049_v8, %v2286_v9  ;;  %v2332_v13 = vld [vmem:[#allocation5 + $0xd0] sm:$0xf]  ;;  %v3062_v14 = vld [vmem:[#allocation5 + $0xd4] sm:$0xf0]  ;;  %v2276_v17 = vld [vmem:[#allocation5 + $0x60] sm:$0xf] }
  0x3d   :  { %451 = vmatpush.bf16.msrb.mxu0 %v2137_v15  ;;  %465 = vmatpush.bf16.msrb.mxu1 %v2201_v16  ;;  %v3061_v15 = vld [vmem:[#allocation5 + $0xd4] sm:$0xf]  ;;  %v2334_v16 = vld [vmem:[#allocation5 + $0xd8] sm:$0xf0]  ;;  %v3048_v18 = vld [vmem:[#allocation5 + $0x64] sm:$0xf0] }
  0x3e   :  { %426 = vmatpush.bf16.msra.mxu2 %v2109_v39  ;;  %440 = vmatpush.bf16.msra.mxu3 %v2173_v40  ;;  %v2277_v19 = vor.u32 %v3048_v18, %v2276_v17  ;;  %v3047_v20 = vld [vmem:[#allocation5 + $0x64] sm:$0xf]  ;;  %v2324_v24 = vld [vmem:[#allocation5 + $0xc0] sm:$0xf]  ;;  %v3060_v25 = vld [vmem:[#allocation5 + $0xc4] sm:$0xf0]  ;;  %v2337_v26 = vor.u32 %v3061_v15, %v2334_v16 }
  0x3f   :  { %v2268_v27 = vld [vmem:[#allocation5 + $0x50] sm:$0xf]  ;;  %v3046_v28 = vld [vmem:[#allocation5 + $0x54] sm:$0xf0]  ;;  %v3045_v29 = vld [vmem:[#allocation5 + $0x54] sm:$0xf] }
  0x40   :  { %v3059_v30 = vld [vmem:[#allocation5 + $0xc4] sm:$0xf]  ;;  %v2270_v32 = vld [vmem:[#allocation5 + $0x58] sm:$0xf0]  ;;  %v2269_v33 = vor.u32 %v3046_v28, %v2268_v27  ;;  %v2316_v47 = vld [vmem:[#allocation5 + $0xb0] sm:$0xf] }
  0x41   :  { %452 = vmatpush.bf16.msrb.mxu0 %v2129_v21  ;;  %466 = vmatpush.bf16.msrb.mxu1 %v2193_v22  ;;  %v2278_v21 = vld [vmem:[#allocation5 + $0x68] sm:$0xf0]  ;;  %v2333_v22 = vor.u32 %v3062_v14, %v2332_v13  ;;  %v2273_v34 = vor.u32 %v3045_v29, %v2270_v32  ;;  %v3058_v48 = vld [vmem:[#allocation5 + $0xb4] sm:$0xf0]  ;;  %v3057_v49 = vld [vmem:[#allocation5 + $0xb4] sm:$0xf] }
  0x42   :  { %427 = vmatpush.bf16.msra.mxu2 %v2101_v50  ;;  %441 = vmatpush.bf16.msra.mxu3 %v2165_v54  ;;  %v2281_v23 = vor.u32 %v3047_v20, %v2278_v21  ;;  %v2317_v50 = vor.u32 %v3058_v48, %v2316_v47  ;;  %v2318_v51 = vld [vmem:[#allocation5 + $0xb8] sm:$0xf0]  ;;  %v2260_v53 = vld [vmem:[#allocation5 + $0x40] sm:$0xf]  ;;  %v3044_v54 = vld [vmem:[#allocation5 + $0x44] sm:$0xf0] }
  0x43   :  { %v2321_v52 = vor.u32 %v3057_v49, %v2318_v51  ;;  %v2261_v56 = vor.u32 %v3044_v54, %v2260_v53  ;;  %v2262_v57 = vld [vmem:[#allocation5 + $0x48] sm:$0xf0]  ;;  %v2308_v59 = vld [vmem:[#allocation5 + $0xa0] sm:$0xf]  ;;  %v3056_v60 = vld [vmem:[#allocation5 + $0xa4] sm:$0xf0] }
  0x44   :  { %v3055_v61 = vld [vmem:[#allocation5 + $0xa4] sm:$0xf]  ;;  %v2310_v63 = vld [vmem:[#allocation5 + $0xa8] sm:$0xf0]  ;;  %v2252_v1 = vld [vmem:[#allocation5 + $0x30] sm:$0xf] }
  0x45   :  { %453 = vmatpush.bf16.msrb.mxu0 %v2121_v31  ;;  %467 = vmatpush.bf16.msrb.mxu1 %v2185_v35  ;;  %v2326_v31 = vld [vmem:[#allocation5 + $0xc8] sm:$0xf0]  ;;  %v2325_v35 = vor.u32 %v3060_v25, %v2324_v24  ;;  %v2313_v0 = vor.u32 %v3055_v61, %v2310_v63  ;;  %v3041_v3 = vld [vmem:[#allocation5 + $0x34] sm:$0xf]  ;;  %v2254_v5 = vld [vmem:[#allocation5 + $0x38] sm:$0xf0] }
  0x46   :  { %688 = vmatpush.bf16.msrb.mxu3 %v2349_v62  ;;  %674 = vmatpush.bf16.msrb.mxu2 %v2285_v11  ;;  %v2329_v36 = vor.u32 %v3059_v30, %v2326_v31  ;;  %v2309_v62 = vor.u32 %v3056_v60, %v2308_v59  ;;  %v2300_v7 = vld [vmem:[#allocation5 + $0x90] sm:$0xf]  ;;  %v3054_v8 = vld [vmem:[#allocation5 + $0x94] sm:$0xf0]  ;;  %v3053_v9 = vld [vmem:[#allocation5 + $0x94] sm:$0xf] }
  0x47   :  { %v2302_v11 = vld [vmem:[#allocation5 + $0x98] sm:$0xf0]  ;;  %v2244_v13 = vld [vmem:[#allocation5 + $0x20] sm:$0xf]  ;;  %v3040_v14 = vld [vmem:[#allocation5 + $0x24] sm:$0xf0] }
  0x48   :  { %v3039_v15 = vld [vmem:[#allocation5 + $0x24] sm:$0xf]  ;;  %v2245_v16 = vor.u32 %v3040_v14, %v2244_v13  ;;  %v2246_v17 = vld [vmem:[#allocation5 + $0x28] sm:$0xf0]  ;;  %v3052_v20 = vld [vmem:[#allocation5 + $0x84] sm:$0xf0] }
  0x49   :  { %454 = vmatpush.bf16.msrb.mxu0 %v2113_v44  ;;  %468 = vmatpush.bf16.msrb.mxu1 %v2177_v46  ;;  %v2249_v18 = vor.u32 %v3039_v15, %v2246_v17  ;;  %v3051_v21 = vld [vmem:[#allocation5 + $0x84] sm:$0xf]  ;;  %v2236_v25 = vld [vmem:[#allocation5 + $0x10] sm:$0xf]  ;;  %v3037_v27 = vld [vmem:[#allocation5 + $0x14] sm:$0xf] }
  0x4a   :  { %689 = vmatpush.bf16.msrb.mxu3 %v2341_v6  ;;  %675 = vmatpush.bf16.msrb.mxu2 %v2277_v19  ;;  %v2257_v6 = vor.u32 %v3041_v3, %v2254_v5  ;;  %v2292_v19 = vld [vmem:[#allocation5 + $0x80] sm:$0xf]  ;;  %v2238_v29 = vld [vmem:[#allocation5 + $0x18] sm:$0xf0]  ;;  %v3036_v32 = vld [vmem:[#allocation5 + $0x4] sm:$0xf0] }
  0x4b   :  { %v2241_v30 = vor.u32 %v3037_v27, %v2238_v29  ;;  %v2228_v31 = vld [vmem:[#allocation5] sm:$0xf]  ;;  %v2412_v47 = vld [vmem:[#allocation7 + $0x70] sm:$0xf]  ;;  %v3082_v49 = vld [vmem:[#allocation7 + $0x74] sm:$0xf0] }
  0x4c   :  { %v2414_v51 = vld [vmem:[#allocation7 + $0x78] sm:$0xf0]  ;;  %v2413_v53 = vor.u32 %v3082_v49, %v2412_v47  ;;  %v2404_v15 = vld [vmem:[#allocation7 + $0x60] sm:$0xf]  ;;  %v3079_v17 = vld [vmem:[#allocation7 + $0x64] sm:$0xf] }
  0x4d   :  { %455 = vmatpush.bf16.msrb.mxu0 %v2105_v55  ;;  %469 = vmatpush.bf16.msrb.mxu1 %v2169_v58  ;;  %v3043_v55 = vld [vmem:[#allocation5 + $0x44] sm:$0xf]  ;;  %v3078_v27 = vld [vmem:[#allocation7 + $0x54] sm:$0xf0]  ;;  %v2438_v49 = vld [vmem:[#allocation7 + $0xa8] sm:$0xf0] }
  0x4e   :  { %690 = vmatpush.bf16.msrb.mxu3 %v2333_v22  ;;  %676 = vmatpush.bf16.msrb.mxu2 %v2269_v33  ;;  %v2265_v58 = vor.u32 %v3043_v55, %v2262_v57  ;;  %v2293_v22 = vor.u32 %v3052_v20, %v2292_v19  ;;  %v3035_v33 = vld [vmem:[#allocation5 + $0x4] sm:$0xf]  ;;  %v2460_v55 = vld [vmem:[#allocation7 + $0xd0] sm:$0xf]  ;;  %v3093_v57 = vld [vmem:[#allocation7 + $0xd4] sm:$0xf] }
  0x4f   :  { %v2406_v19 = vld [vmem:[#allocation7 + $0x68] sm:$0xf0]  ;;  %v3087_v47 = vld [vmem:[#allocation7 + $0xa4] sm:$0xf]  ;;  %s2038_s16 = sshll.u32 %s3428_s15, 4  ;;  %s2040_s19 = sshll.u32 %s3614_s9, 4  ;;  %s2039_s16 = int_to_ptr.vmem [resolvable:$true] %s2038_s16  ;;  %s2041_s19 = int_to_ptr.hbm [resolvable:$true] %s2040_s19 }
  0x50   :  { %v2409_v20 = vor.u32 %v3079_v17, %v2406_v19  ;;  %v2356_v17 = vld [vmem:[#allocation7] sm:$0xf]  ;;  %v3067_v19 = vld [vmem:[#allocation7 + $0x4] sm:$0xf]  ;;  %s3429_s21 = smov 512   ;;  %s3430_s22 = smov 32  }
  0x51   :  { %716 = vmatpush.bf16.msra.mxu1 %v2353_v2  ;;  %702 = vmatpush.bf16.msra.mxu0 %v2289_v12  ;;  %v3042_v2 = vld [vmem:[#allocation5 + $0x34] sm:$0xf0]  ;;  %v2305_v12 = vor.u32 %v3053_v9, %v2302_v11 }
  0x52   :  { %691 = vmatpush.bf16.msrb.mxu3 %v2325_v35  ;;  %677 = vmatpush.bf16.msrb.mxu2 %v2261_v56  ;;  %v2253_v4 = vor.u32 %v3042_v2, %v2252_v1  ;;  %v2230_v35 = vld [vmem:[#allocation5 + $0x8] sm:$0xf0]  ;;  %v3094_v56 = vld [vmem:[#allocation7 + $0xd4] sm:$0xf0] }
  0x53   :  { %v2461_v59 = vor.u32 %v3094_v56, %v2460_v55  ;;  %v2382_v55 = vld [vmem:[#allocation7 + $0x38] sm:$0xf0] }
  0x55   :  { %717 = vmatpush.bf16.msra.mxu1 %v2345_v10  ;;  %703 = vmatpush.bf16.msra.mxu0 %v2281_v23  ;;  %v2301_v10 = vor.u32 %v3054_v8, %v2300_v7  ;;  %v2294_v23 = vld [vmem:[#allocation5 + $0x88] sm:$0xf0] }
  0x56   :  { %692 = vmatpush.bf16.msrb.mxu3 %v2317_v50  ;;  %678 = vmatpush.bf16.msrb.mxu2 %v2253_v4  ;;  %v2297_v24 = vor.u32 %v3051_v21, %v2294_v23  ;;  %v3081_v50 = vld [vmem:[#allocation7 + $0x74] sm:$0xf]  ;;  %v2452_v21 = vld [vmem:[#allocation7 + $0xc0] sm:$0xf]  ;;  %v3091_v23 = vld [vmem:[#allocation7 + $0xc4] sm:$0xf] }
  0x57   :  { %v2417_v54 = vor.u32 %v3081_v50, %v2414_v51  ;;  %v2441_v50 = vor.u32 %v3087_v47, %v2438_v49  ;;  %v2380_v51 = vld [vmem:[#allocation7 + $0x30] sm:$0xf] }
  0x59   :  { %718 = vmatpush.bf16.msra.mxu1 %v2337_v26  ;;  %704 = vmatpush.bf16.msra.mxu0 %v2273_v34  ;;  %v3038_v26 = vld [vmem:[#allocation5 + $0x14] sm:$0xf0]  ;;  %v2229_v34 = vor.u32 %v3036_v32, %v2228_v31  ;;  %v2398_v31 = vld [vmem:[#allocation7 + $0x58] sm:$0xf0] }
  0x5a   :  { %693 = vmatpush.bf16.msrb.mxu3 %v2309_v62  ;;  %679 = vmatpush.bf16.msrb.mxu2 %v2245_v16  ;;  %v2237_v28 = vor.u32 %v3038_v26, %v2236_v25  ;;  %v3080_v16 = vld [vmem:[#allocation7 + $0x64] sm:$0xf0]  ;;  %v2454_v25 = vld [vmem:[#allocation7 + $0xc8] sm:$0xf0]  ;;  %v2396_v26 = vld [vmem:[#allocation7 + $0x50] sm:$0xf] }
  0x5b   :  { %v2397_v29 = vor.u32 %v3078_v27, %v2396_v26  ;;  %v2606_v27 = vld [vmem:[#allocation8 + $0xf8] sm:$0xf0] }
  0x5d   :  { %719 = vmatpush.bf16.msra.mxu1 %v2329_v36  ;;  %705 = vmatpush.bf16.msra.mxu0 %v2265_v58  ;;  %v2233_v36 = vor.u32 %v3035_v33, %v2230_v35  ;;  %v2462_v58 = vld [vmem:[#allocation7 + $0xd8] sm:$0xf0]  ;;  %v2444_v33 = vld [vmem:[#allocation7 + $0xb0] sm:$0xf]  ;;  %v3089_v35 = vld [vmem:[#allocation7 + $0xb4] sm:$0xf] }
  0x5e   :  { %694 = vmatpush.bf16.msrb.mxu3 %v2301_v10  ;;  %680 = vmatpush.bf16.msrb.mxu2 %v2237_v28  ;;  %v2465_v60 = vor.u32 %v3093_v57, %v2462_v58  ;;  %v2457_v28 = vor.u32 %v3091_v23, %v2454_v25  ;;  %v2428_v57 = vld [vmem:[#allocation7 + $0x90] sm:$0xf]  ;;  %v3086_v58 = vld [vmem:[#allocation7 + $0x94] sm:$0xf0]  ;;  %v3129_v25 = vld [vmem:[#allocation8 + $0xf4] sm:$0xf] }
  0x5f   :  { %v2604_v23 = vld [vmem:[#allocation8 + $0xf0] sm:$0xf] }
  0x61   :  { %720 = vmatpush.bf16.msra.mxu1 %v2321_v52  ;;  %706 = vmatpush.bf16.msra.mxu0 %v2257_v6 }
  0x62   :  { %695 = vmatpush.bf16.msrb.mxu3 %v2293_v22  ;;  %681 = vmatpush.bf16.msrb.mxu2 %v2229_v34  ;;  %v3092_v22 = vld [vmem:[#allocation7 + $0xc4] sm:$0xf0]  ;;  %v3090_v34 = vld [vmem:[#allocation7 + $0xb4] sm:$0xf0] }
  0x65   :  { %721 = vmatpush.bf16.msra.mxu1 %v2313_v0  ;;  %707 = vmatpush.bf16.msra.mxu0 %v2249_v18  ;;  %v2405_v18 = vor.u32 %v3080_v16, %v2404_v15  ;;  %v2366_v15 = vld [vmem:[#allocation7 + $0x18] sm:$0xf0] }
  0x69   :  { %722 = vmatpush.bf16.msra.mxu1 %v2305_v12  ;;  %708 = vmatpush.bf16.msra.mxu0 %v2241_v30  ;;  %v3077_v30 = vld [vmem:[#allocation7 + $0x54] sm:$0xf] }
  0x6a   :  { %v2401_v32 = vor.u32 %v3077_v30, %v2398_v31  ;;  %v2609_v30 = vor.u32 %v3129_v25, %v2606_v27  ;;  %v3127_v31 = vld [vmem:[#allocation8 + $0xe4] sm:$0xf]  ;;  %v2516_v25 = vld [vmem:[#allocation8 + $0x40] sm:$0xf] }
  0x6b   :  { %v3107_v27 = vld [vmem:[#allocation8 + $0x44] sm:$0xf] }
  0x6d   :  { %723 = vmatpush.bf16.msra.mxu1 %v2297_v24  ;;  %709 = vmatpush.bf16.msra.mxu0 %v2233_v36  ;;  %v2453_v24 = vor.u32 %v3092_v22, %v2452_v21  ;;  %v2445_v36 = vor.u32 %v3090_v34, %v2444_v33  ;;  %v2358_v21 = vld [vmem:[#allocation7 + $0x8] sm:$0xf0]  ;;  %v2540_v33 = vld [vmem:[#allocation8 + $0x70] sm:$0xf] }
  0x6e   :  { %v2361_v22 = vor.u32 %v3067_v19, %v2358_v21  ;;  %v2572_v19 = vld [vmem:[#allocation8 + $0xb0] sm:$0xf]  ;;  %v3121_v21 = vld [vmem:[#allocation8 + $0xb4] sm:$0xf] }
  0xad   :  { %v203_v37 = vpop.f32.mrf.mxu0  ;;  %v217_v38 = vpop.f32.mrf.mxu1 }
  0xae   :  { %v222_v40 = vmax.f32 %v203_v37, 0.0  ;;  %v223_v43 = vmax.f32 %v217_v38, 0.0  ;;  %v2476_v37 = vld [vmem:[#allocation7 + $0xf0] sm:$0xf]  ;;  %v3098_v38 = vld [vmem:[#allocation7 + $0xf4] sm:$0xf0] }
  0xb5   :  { %v205_v39 = vpop.f32.mrf.mxu0  ;;  %v219_v42 = vpop.f32.mrf.mxu1 }
  0xb6   :  { %v224_v41 = vmax.f32 %v205_v39, 0.0  ;;  %v225_v44 = vmax.f32 %v219_v42, 0.0  ;;  %v3097_v39 = vld [vmem:[#allocation7 + $0xf4] sm:$0xf]  ;;  %v2468_v42 = vld [vmem:[#allocation7 + $0xe0] sm:$0xf] }
  0xb8   :  { %v226_v45 = vpack.c.bf16 %v224_v41, %v222_v40  ;;  %v227_v46 = vpack.c.bf16 %v225_v44, %v223_v43  ;;  %v2477_v40 = vor.u32 %v3098_v38, %v2476_v37  ;;  %v2478_v41 = vld [vmem:[#allocation7 + $0xf8] sm:$0xf0]  ;;  %v3096_v43 = vld [vmem:[#allocation7 + $0xe4] sm:$0xf0] }
  0xb9   :  { %v2481_v44 = vor.u32 %v3097_v39, %v2478_v41  ;;  %v2469_v48 = vor.u32 %v3096_v43, %v2468_v42  ;;  %v2446_v37 = vld [vmem:[#allocation7 + $0xb8] sm:$0xf0]  ;;  %v2388_v39 = vld [vmem:[#allocation7 + $0x40] sm:$0xf]  ;;  %v3075_v41 = vld [vmem:[#allocation7 + $0x44] sm:$0xf] }
  0xba   :  { %428 = vmatmul.bf16.vlgmr.msra.gmra.mxu2 %v226_v45  ;;  %456 = vmatmul.bf16.vlgmr.msrb.gmra.mxu0 %v226_v45  ;;  %v3095_v45 = vld [vmem:[#allocation7 + $0xe4] sm:$0xf]  ;;  %v2449_v38 = vor.u32 %v3089_v35, %v2446_v37  ;;  %v2390_v43 = vld [vmem:[#allocation7 + $0x48] sm:$0xf0]  ;;  %v3114_v35 = vld [vmem:[#allocation8 + $0x74] sm:$0xf0] }
  0xbb   :  { %442 = vmatmul.bf16.vlgmr.msra.gmra.mxu3 %v227_v46  ;;  %470 = vmatmul.bf16.vlgmr.msrb.gmra.mxu1 %v227_v46  ;;  %v2470_v46 = vld [vmem:[#allocation7 + $0xe8] sm:$0xf0]  ;;  %v2542_v37 = vld [vmem:[#allocation8 + $0x78] sm:$0xf0] }
  0xbc   :  { %942 = vmatpush.bf16.msra.mxu3 %v2477_v40  ;;  %970 = vmatpush.bf16.msrb.mxu1 %v2481_v44  ;;  %v2473_v52 = vor.u32 %v3095_v45, %v2470_v46  ;;  %v3076_v40 = vld [vmem:[#allocation7 + $0x44] sm:$0xf0]  ;;  %v2393_v44 = vor.u32 %v3075_v41, %v2390_v43  ;;  %v2436_v45 = vld [vmem:[#allocation7 + $0xa0] sm:$0xf]  ;;  %v2588_v41 = vld [vmem:[#allocation8 + $0xd0] sm:$0xf] }
  0xbd   :  { %928 = vmatpush.bf16.msra.mxu2 %v2413_v53  ;;  %956 = vmatpush.bf16.msrb.mxu0 %v2417_v54  ;;  %v2389_v42 = vor.u32 %v3076_v40, %v2388_v39  ;;  %v3088_v46 = vld [vmem:[#allocation7 + $0xa4] sm:$0xf0]  ;;  %v3073_v53 = vld [vmem:[#allocation7 + $0x34] sm:$0xf]  ;;  %v2541_v39 = vor.u32 %v3114_v35, %v2540_v33  ;;  %v3119_v33 = vld [vmem:[#allocation8 + $0xa4] sm:$0xf] }
  0xbe   :  { %v2385_v56 = vor.u32 %v3073_v53, %v2382_v55  ;;  %v3125_v43 = vld [vmem:[#allocation8 + $0xd4] sm:$0xf]  ;;  %v2566_v35 = vld [vmem:[#allocation8 + $0xa8] sm:$0xf0] }
  0xc0   :  { %943 = vmatpush.bf16.msra.mxu3 %v2469_v48  ;;  %971 = vmatpush.bf16.msrb.mxu1 %v2473_v52  ;;  %v2437_v48 = vor.u32 %v3088_v46, %v2436_v45  ;;  %v3074_v52 = vld [vmem:[#allocation7 + $0x34] sm:$0xf0] }
  0xc1   :  { %929 = vmatpush.bf16.msra.mxu2 %v2405_v18  ;;  %957 = vmatpush.bf16.msrb.mxu0 %v2409_v20  ;;  %v2381_v54 = vor.u32 %v3074_v52, %v2380_v51  ;;  %v3068_v18 = vld [vmem:[#allocation7 + $0x4] sm:$0xf0] }
  0xc2   :  { %v2357_v20 = vor.u32 %v3068_v18, %v2356_v17  ;;  %v2526_v17 = vld [vmem:[#allocation8 + $0x58] sm:$0xf0] }
  0xc4   :  { %944 = vmatpush.bf16.msra.mxu3 %v2461_v59  ;;  %972 = vmatpush.bf16.msrb.mxu1 %v2465_v60  ;;  %v3085_v59 = vld [vmem:[#allocation7 + $0x94] sm:$0xf]  ;;  %v2429_v60 = vor.u32 %v3086_v58, %v2428_v57 }
  0xc5   :  { %930 = vmatpush.bf16.msra.mxu2 %v2397_v29  ;;  %958 = vmatpush.bf16.msrb.mxu0 %v2401_v32  ;;  %v3128_v29 = vld [vmem:[#allocation8 + $0xe4] sm:$0xf0]  ;;  %v2598_v32 = vld [vmem:[#allocation8 + $0xe8] sm:$0xf0] }
  0xc8   :  { %945 = vmatpush.bf16.msra.mxu3 %v2453_v24  ;;  %973 = vmatpush.bf16.msrb.mxu1 %v2457_v28  ;;  %v3130_v24 = vld [vmem:[#allocation8 + $0xf4] sm:$0xf0]  ;;  %v2596_v28 = vld [vmem:[#allocation8 + $0xe0] sm:$0xf] }
  0xc9   :  { %931 = vmatpush.bf16.msra.mxu2 %v2389_v42  ;;  %959 = vmatpush.bf16.msrb.mxu0 %v2393_v44  ;;  %v2605_v26 = vor.u32 %v3130_v24, %v2604_v23  ;;  %v2597_v34 = vor.u32 %v3128_v29, %v2596_v28  ;;  %v3126_v42 = vld [vmem:[#allocation8 + $0xd4] sm:$0xf0]  ;;  %v2590_v44 = vld [vmem:[#allocation8 + $0xd8] sm:$0xf0]  ;;  %v2518_v29 = vld [vmem:[#allocation8 + $0x48] sm:$0xf0] }
  0xca   :  { %v2589_v45 = vor.u32 %v3126_v42, %v2588_v41  ;;  %v2593_v46 = vor.u32 %v3125_v43, %v2590_v44  ;;  %v2574_v23 = vld [vmem:[#allocation8 + $0xb8] sm:$0xf0]  ;;  %v2556_v43 = vld [vmem:[#allocation8 + $0x90] sm:$0xf]  ;;  %v3118_v44 = vld [vmem:[#allocation8 + $0x94] sm:$0xf0] }
  0xcb   :  { %v2577_v24 = vor.u32 %v3121_v21, %v2574_v23  ;;  %v2510_v41 = vld [vmem:[#allocation8 + $0x38] sm:$0xf0]  ;;  %v3146_v21 = vld [vmem:[#allocation10 + $0x74] sm:$0xf0] }
  0xcc   :  { %946 = vmatpush.bf16.msra.mxu3 %v2445_v36  ;;  %974 = vmatpush.bf16.msrb.mxu1 %v2449_v38  ;;  %v3113_v36 = vld [vmem:[#allocation8 + $0x74] sm:$0xf]  ;;  %v2601_v38 = vor.u32 %v3127_v31, %v2598_v32  ;;  %v2564_v31 = vld [vmem:[#allocation8 + $0xa0] sm:$0xf]  ;;  %v3120_v32 = vld [vmem:[#allocation8 + $0xa4] sm:$0xf0] }
  0xcd   :  { %932 = vmatpush.bf16.msra.mxu2 %v2381_v54  ;;  %960 = vmatpush.bf16.msrb.mxu0 %v2385_v56  ;;  %v2545_v40 = vor.u32 %v3113_v36, %v2542_v37  ;;  %v2569_v36 = vor.u32 %v3119_v33, %v2566_v35  ;;  %v2508_v37 = vld [vmem:[#allocation8 + $0x30] sm:$0xf]  ;;  %v2670_v23 = vld [vmem:[#allocation10 + $0x78] sm:$0xf0] }
  0xd0   :  { %947 = vmatpush.bf16.msra.mxu3 %v2437_v48  ;;  %975 = vmatpush.bf16.msrb.mxu1 %v2441_v50 }
  0xd4   :  { %948 = vmatpush.bf16.msra.mxu3 %v2429_v60 }
 0x137   :  { %v457_v61 = vpop.f32.mrf.mxu0 }
 0x138   :  { %v471_v62 = vpop.f32.mrf.mxu1 }
 0x139   :  { %v472_v1 = vadd.f32 %v471_v62, %v457_v61  ;;  %v2430_v61 = vld [vmem:[#allocation7 + $0x98] sm:$0xf0] }
 0x13a   :  { %v2433_v62 = vor.u32 %v3085_v59, %v2430_v61 }
 0x13b   :  { %v477_v5 = vmax.f32 %v472_v1, 0.0  ;;  %v3071_v1 = vld [vmem:[#allocation7 + $0x24] sm:$0xf] }
 0x13c   :  { %976 = vmatpush.bf16.msrb.mxu1 %v2433_v62 }
 0x13d   :  { %v429_v63 = vpop.f32.mrf.mxu2 }
 0x13e   :  { %v443_v0 = vpop.f32.mrf.mxu3 }
 0x13f   :  { %v459_v2 = vpop.f32.mrf.mxu0  ;;  %v444_v7 = vadd.f32 %v443_v0, %v429_v63  ;;  %v2372_v63 = vld [vmem:[#allocation7 + $0x20] sm:$0xf]  ;;  %v3072_v0 = vld [vmem:[#allocation7 + $0x24] sm:$0xf0] }
 0x140   :  { %v473_v3 = vpop.f32.mrf.mxu1 }
 0x141   :  { %v474_v4 = vadd.f32 %v473_v3, %v459_v2  ;;  %v476_v12 = vmax.f32 %v444_v7, 0.0  ;;  %v2373_v2 = vor.u32 %v3072_v0, %v2372_v63  ;;  %v2374_v3 = vld [vmem:[#allocation7 + $0x28] sm:$0xf0]  ;;  %v3083_v7 = vld [vmem:[#allocation7 + $0x84] sm:$0xf] }
 0x143   :  { %v479_v6 = vmax.f32 %v474_v4, 0.0  ;;  %v2377_v4 = vor.u32 %v3071_v1, %v2374_v3  ;;  %933 = vmatpush.bf16.msra.mxu2 %v2373_v2  ;;  %v2532_v1 = vld [vmem:[#allocation8 + $0x60] sm:$0xf]  ;;  %v3112_v2 = vld [vmem:[#allocation8 + $0x64] sm:$0xf0] }
 0x144   :  { %v3111_v3 = vld [vmem:[#allocation8 + $0x64] sm:$0xf] }
 0x145   :  { %v481_v8 = vpack.c.bf16 %v479_v6, %v477_v5  ;;  %v431_v9 = vpop.f32.mrf.mxu2  ;;  %v2420_v5 = vld [vmem:[#allocation7 + $0x80] sm:$0xf]  ;;  %v3084_v6 = vld [vmem:[#allocation7 + $0x84] sm:$0xf0]  ;;  %961 = vmatpush.bf16.msrb.mxu0 %v2377_v4  ;;  %v2533_v4 = vor.u32 %v3112_v2, %v2532_v1  ;;  %v2494_v1 = vld [vmem:[#allocation8 + $0x18] sm:$0xf0] }
 0x146   :  { %v445_v10 = vpop.f32.mrf.mxu3 }
 0x147   :  { %v446_v11 = vadd.f32 %v445_v10, %v431_v9  ;;  %696 = vmatmul.bf16.vlgmr.msrb.gmra.mxu3 %v481_v8  ;;  %724 = vmatmul.bf16.vlgmr.msra.gmra.mxu1 %v481_v8  ;;  %v2421_v8 = vor.u32 %v3084_v6, %v2420_v5  ;;  %v2422_v9 = vld [vmem:[#allocation7 + $0x88] sm:$0xf0] }
 0x148   :  { %v2425_v10 = vor.u32 %v3083_v7, %v2422_v9  ;;  %v2534_v5 = vld [vmem:[#allocation8 + $0x68] sm:$0xf0]  ;;  %v2580_v7 = vld [vmem:[#allocation8 + $0xc0] sm:$0xf]  ;;  %v3123_v9 = vld [vmem:[#allocation8 + $0xc4] sm:$0xf] }
 0x149   :  { %v478_v13 = vmax.f32 %v446_v11, 0.0  ;;  %v2364_v11 = vld [vmem:[#allocation7 + $0x10] sm:$0xf]  ;;  %949 = vmatpush.bf16.msra.mxu3 %v2421_v8  ;;  %v2537_v6 = vor.u32 %v3111_v3, %v2534_v5  ;;  %v3124_v8 = vld [vmem:[#allocation8 + $0xc4] sm:$0xf0] }
 0x14a   :  { %977 = vmatpush.bf16.msrb.mxu1 %v2425_v10  ;;  %v2581_v10 = vor.u32 %v3124_v8, %v2580_v7  ;;  %v2484_v3 = vld [vmem:[#allocation8] sm:$0xf]  ;;  %v3099_v5 = vld [vmem:[#allocation8 + $0x4] sm:$0xf]  ;;  %v2486_v7 = vld [vmem:[#allocation8 + $0x8] sm:$0xf0] }
 0x14b   :  { %v480_v14 = vpack.c.bf16 %v478_v13, %v476_v12  ;;  %v3070_v12 = vld [vmem:[#allocation7 + $0x14] sm:$0xf0]  ;;  %v3069_v13 = vld [vmem:[#allocation7 + $0x14] sm:$0xf]  ;;  %v2489_v8 = vor.u32 %v3099_v5, %v2486_v7  ;;  %v2700_v5 = vld [vmem:[#allocation10 + $0xb0] sm:$0xf] }
 0x14c   :  { %v2369_v16 = vor.u32 %v3069_v13, %v2366_v15  ;;  %v3110_v13 = vld [vmem:[#allocation8 + $0x54] sm:$0xf0]  ;;  %v3153_v7 = vld [vmem:[#allocation10 + $0xb4] sm:$0xf] }
 0x14d   :  { %682 = vmatmul.bf16.vlgmr.msrb.gmra.mxu2 %v480_v14  ;;  %710 = vmatmul.bf16.vlgmr.msra.gmra.mxu0 %v480_v14  ;;  %v2365_v14 = vor.u32 %v3070_v12, %v2364_v11  ;;  %v2582_v11 = vld [vmem:[#allocation8 + $0xc8] sm:$0xf0]  ;;  %v2524_v12 = vld [vmem:[#allocation8 + $0x50] sm:$0xf] }
 0x14e   :  { %962 = vmatpush.bf16.msrb.mxu0 %v2369_v16  ;;  %1196 = vmatpush.bf16.msrb.mxu3 %v2605_v26  ;;  %v2525_v15 = vor.u32 %v3110_v13, %v2524_v12  ;;  %v3109_v16 = vld [vmem:[#allocation8 + $0x54] sm:$0xf]  ;;  %v3108_v26 = vld [vmem:[#allocation8 + $0x44] sm:$0xf0]  ;;  %v2734_v13 = vld [vmem:[#allocation10 + $0xf8] sm:$0xf0] }
 0x14f   :  { %934 = vmatpush.bf16.msra.mxu2 %v2365_v14  ;;  %1224 = vmatpush.bf16.msra.mxu1 %v2609_v30  ;;  %v2585_v14 = vor.u32 %v3123_v9, %v2582_v11  ;;  %v2529_v18 = vor.u32 %v3109_v16, %v2526_v17  ;;  %v2517_v28 = vor.u32 %v3108_v26, %v2516_v25  ;;  %v2732_v9 = vld [vmem:[#allocation10 + $0xf0] sm:$0xf]  ;;  %v3161_v11 = vld [vmem:[#allocation10 + $0xf4] sm:$0xf]  ;;  %v3159_v17 = vld [vmem:[#allocation10 + $0xe4] sm:$0xf] }
 0x150   :  { %v2521_v30 = vor.u32 %v3107_v27, %v2518_v29  ;;  %v2737_v16 = vor.u32 %v3161_v11, %v2734_v13  ;;  %v2716_v27 = vld [vmem:[#allocation10 + $0xd0] sm:$0xf]  ;;  %v3157_v29 = vld [vmem:[#allocation10 + $0xd4] sm:$0xf]  ;;  %v2644_v11 = vld [vmem:[#allocation10 + $0x40] sm:$0xf] }
 0x151   :  { %v3139_v13 = vld [vmem:[#allocation10 + $0x44] sm:$0xf] }
 0x152   :  { %963 = vmatpush.bf16.msrb.mxu0 %v2361_v22  ;;  %1197 = vmatpush.bf16.msrb.mxu3 %v2597_v34  ;;  %v2565_v34 = vor.u32 %v3120_v32, %v2564_v31 }
 0x153   :  { %935 = vmatpush.bf16.msra.mxu2 %v2357_v20  ;;  %1225 = vmatpush.bf16.msra.mxu1 %v2601_v38  ;;  %v3122_v20 = vld [vmem:[#allocation8 + $0xb4] sm:$0xf0] }
 0x154   :  { %v2573_v22 = vor.u32 %v3122_v20, %v2572_v19  ;;  %v3106_v38 = vld [vmem:[#allocation8 + $0x34] sm:$0xf0]  ;;  %v2668_v19 = vld [vmem:[#allocation10 + $0x70] sm:$0xf] }
 0x155   :  { %v2669_v25 = vor.u32 %v3146_v21, %v2668_v19  ;;  %v3151_v19 = vld [vmem:[#allocation10 + $0xa4] sm:$0xf]  ;;  %v2694_v21 = vld [vmem:[#allocation10 + $0xa8] sm:$0xf0] }
 0x156   :  { %1210 = vmatpush.bf16.msra.mxu0 %v2545_v40  ;;  %1198 = vmatpush.bf16.msrb.mxu3 %v2589_v45  ;;  %v2509_v40 = vor.u32 %v3106_v38, %v2508_v37  ;;  %v3117_v45 = vld [vmem:[#allocation8 + $0x94] sm:$0xf] }
 0x157   :  { %1182 = vmatpush.bf16.msrb.mxu2 %v2541_v39  ;;  %1226 = vmatpush.bf16.msra.mxu1 %v2593_v46  ;;  %v3105_v39 = vld [vmem:[#allocation8 + $0x34] sm:$0xf]  ;;  %v2557_v46 = vor.u32 %v3118_v44, %v2556_v43 }
 0x158   :  { %v2513_v42 = vor.u32 %v3105_v39, %v2510_v41 }
 0x15a   :  { %1211 = vmatpush.bf16.msra.mxu0 %v2537_v6  ;;  %1199 = vmatpush.bf16.msrb.mxu3 %v2581_v10  ;;  %v3162_v10 = vld [vmem:[#allocation10 + $0xf4] sm:$0xf0] }
 0x15b   :  { %1183 = vmatpush.bf16.msrb.mxu2 %v2533_v4  ;;  %1227 = vmatpush.bf16.msra.mxu1 %v2585_v14  ;;  %v3100_v4 = vld [vmem:[#allocation8 + $0x4] sm:$0xf0]  ;;  %v2733_v12 = vor.u32 %v3162_v10, %v2732_v9  ;;  %v2724_v14 = vld [vmem:[#allocation10 + $0xe0] sm:$0xf]  ;;  %v2702_v9 = vld [vmem:[#allocation10 + $0xb8] sm:$0xf0] }
 0x15c   :  { %v2485_v6 = vor.u32 %v3100_v4, %v2484_v3  ;;  %v2654_v3 = vld [vmem:[#allocation10 + $0x58] sm:$0xf0]  ;;  %v2705_v10 = vor.u32 %v3153_v7, %v2702_v9  ;;  %v3193_v7 = vld [vmem:[#allocation11 + $0xec] sm:$0xf0]  ;;  %v2854_v9 = vld [vmem:[#allocation11 + $0xf0] sm:$0xf0] }
 0x15e   :  { %1212 = vmatpush.bf16.msra.mxu0 %v2529_v18  ;;  %1200 = vmatpush.bf16.msrb.mxu3 %v2573_v22  ;;  %v2726_v18 = vld [vmem:[#allocation10 + $0xe8] sm:$0xf0]  ;;  %v3145_v22 = vld [vmem:[#allocation10 + $0x74] sm:$0xf] }
 0x15f   :  { %1184 = vmatpush.bf16.msrb.mxu2 %v2525_v15  ;;  %1228 = vmatpush.bf16.msra.mxu1 %v2577_v24  ;;  %v3160_v15 = vld [vmem:[#allocation10 + $0xe4] sm:$0xf0]  ;;  %v2729_v24 = vor.u32 %v3159_v17, %v2726_v18  ;;  %v2673_v26 = vor.u32 %v3145_v22, %v2670_v23  ;;  %v2692_v17 = vld [vmem:[#allocation10 + $0xa0] sm:$0xf]  ;;  %v2697_v22 = vor.u32 %v3151_v19, %v2694_v21  ;;  %v2636_v23 = vld [vmem:[#allocation10 + $0x30] sm:$0xf] }
 0x160   :  { %v2725_v20 = vor.u32 %v3160_v15, %v2724_v14  ;;  %v2646_v15 = vld [vmem:[#allocation10 + $0x48] sm:$0xf0]  ;;  %v3152_v18 = vld [vmem:[#allocation10 + $0xa4] sm:$0xf0]  ;;  %v2838_v21 = vld [vmem:[#allocation11 + $0xd0] sm:$0xf0] }
 0x162   :  { %1213 = vmatpush.bf16.msra.mxu0 %v2521_v30  ;;  %1201 = vmatpush.bf16.msrb.mxu3 %v2565_v34  ;;  %v2718_v30 = vld [vmem:[#allocation10 + $0xd8] sm:$0xf0] }
 0x163   :  { %1185 = vmatpush.bf16.msrb.mxu2 %v2517_v28  ;;  %1229 = vmatpush.bf16.msra.mxu1 %v2569_v36  ;;  %v3158_v28 = vld [vmem:[#allocation10 + $0xd4] sm:$0xf0]  ;;  %v2721_v32 = vor.u32 %v3157_v29, %v2718_v30  ;;  %v2684_v29 = vld [vmem:[#allocation10 + $0x90] sm:$0xf] }
 0x164   :  { %v2717_v31 = vor.u32 %v3158_v28, %v2716_v27  ;;  %v2638_v27 = vld [vmem:[#allocation10 + $0x38] sm:$0xf0]  ;;  %v3150_v30 = vld [vmem:[#allocation10 + $0x94] sm:$0xf0] }
 0x166   :  { %1214 = vmatpush.bf16.msra.mxu0 %v2513_v42  ;;  %1202 = vmatpush.bf16.msrb.mxu3 %v2557_v46 }
 0x167   :  { %1186 = vmatpush.bf16.msrb.mxu2 %v2509_v40 }
 0x1c4   :  { %v725_v47 = vpop.f32.mrf.mxu1 }
 0x1ca   :  { %v711_v48 = vpop.f32.mrf.mxu0  ;;  %v697_v49 = vpop.f32.mrf.mxu3 }
 0x1cb   :  { %v726_v51 = vadd.f32 %v725_v47, %v711_v48  ;;  %v2558_v47 = vld [vmem:[#allocation8 + $0x98] sm:$0xf0] }
 0x1cc   :  { %v727_v52 = vpop.f32.mrf.mxu1  ;;  %v2561_v48 = vor.u32 %v3117_v45, %v2558_v47 }
 0x1cd   :  { %v731_v55 = vmax.f32 %v726_v51, 0.0  ;;  %v3103_v51 = vld [vmem:[#allocation8 + $0x24] sm:$0xf] }
 0x1ce   :  { %1230 = vmatpush.bf16.msra.mxu1 %v2561_v48 }
 0x1d0   :  { %v683_v50 = vpop.f32.mrf.mxu2 }
 0x1d1   :  { %v698_v57 = vadd.f32 %v697_v49, %v683_v50  ;;  %v2500_v49 = vld [vmem:[#allocation8 + $0x20] sm:$0xf]  ;;  %v3104_v50 = vld [vmem:[#allocation8 + $0x24] sm:$0xf0] }
 0x1d2   :  { %v713_v53 = vpop.f32.mrf.mxu0  ;;  %v699_v59 = vpop.f32.mrf.mxu3 }
 0x1d3   :  { %v728_v54 = vadd.f32 %v727_v52, %v713_v53  ;;  %v730_v62 = vmax.f32 %v698_v57, 0.0  ;;  %v2501_v52 = vor.u32 %v3104_v50, %v2500_v49  ;;  %v2502_v53 = vld [vmem:[#allocation8 + $0x28] sm:$0xf0]  ;;  %v3115_v57 = vld [vmem:[#allocation8 + $0x84] sm:$0xf] }
 0x1d5   :  { %v733_v56 = vmax.f32 %v728_v54, 0.0  ;;  %v2505_v54 = vor.u32 %v3103_v51, %v2502_v53  ;;  %1187 = vmatpush.bf16.msrb.mxu2 %v2501_v52  ;;  %v2660_v51 = vld [vmem:[#allocation10 + $0x60] sm:$0xf]  ;;  %v3144_v52 = vld [vmem:[#allocation10 + $0x64] sm:$0xf0] }
 0x1d6   :  { %v3143_v53 = vld [vmem:[#allocation10 + $0x64] sm:$0xf] }
 0x1d7   :  { %v735_v58 = vpack.c.bf16 %v733_v56, %v731_v55  ;;  %v2548_v55 = vld [vmem:[#allocation8 + $0x80] sm:$0xf]  ;;  %v3116_v56 = vld [vmem:[#allocation8 + $0x84] sm:$0xf0]  ;;  %1215 = vmatpush.bf16.msra.mxu0 %v2505_v54  ;;  %v2661_v54 = vor.u32 %v3144_v52, %v2660_v51  ;;  %v2622_v51 = vld [vmem:[#allocation10 + $0x18] sm:$0xf0] }
 0x1d8   :  { %v685_v60 = vpop.f32.mrf.mxu2 }
 0x1d9   :  { %v700_v61 = vadd.f32 %v699_v59, %v685_v60  ;;  %950 = vmatmul.bf16.vlgmr.msra.gmra.mxu3 %v735_v58  ;;  %978 = vmatmul.bf16.vlgmr.msrb.gmra.mxu1 %v735_v58  ;;  %v2549_v58 = vor.u32 %v3116_v56, %v2548_v55  ;;  %v2550_v59 = vld [vmem:[#allocation8 + $0x88] sm:$0xf0] }
 0x1da   :  { %v2553_v60 = vor.u32 %v3115_v57, %v2550_v59  ;;  %v2662_v55 = vld [vmem:[#allocation10 + $0x68] sm:$0xf0]  ;;  %v2708_v57 = vld [vmem:[#allocation10 + $0xc0] sm:$0xf]  ;;  %v3155_v59 = vld [vmem:[#allocation10 + $0xc4] sm:$0xf] }
 0x1db   :  { %v732_v63 = vmax.f32 %v700_v61, 0.0  ;;  %v2492_v61 = vld [vmem:[#allocation8 + $0x10] sm:$0xf]  ;;  %1203 = vmatpush.bf16.msrb.mxu3 %v2549_v58  ;;  %v2665_v56 = vor.u32 %v3143_v53, %v2662_v55  ;;  %v3156_v58 = vld [vmem:[#allocation10 + $0xc4] sm:$0xf0] }
 0x1dc   :  { %1231 = vmatpush.bf16.msra.mxu1 %v2553_v60  ;;  %v2709_v60 = vor.u32 %v3156_v58, %v2708_v57  ;;  %v2612_v53 = vld [vmem:[#allocation10] sm:$0xf]  ;;  %v3131_v55 = vld [vmem:[#allocation10 + $0x4] sm:$0xf]  ;;  %v2614_v57 = vld [vmem:[#allocation10 + $0x8] sm:$0xf0] }
 0x1dd   :  { %v734_v0 = vpack.c.bf16 %v732_v63, %v730_v62  ;;  %v3102_v62 = vld [vmem:[#allocation8 + $0x14] sm:$0xf0]  ;;  %v3101_v63 = vld [vmem:[#allocation8 + $0x14] sm:$0xf]  ;;  %v2617_v58 = vor.u32 %v3131_v55, %v2614_v57  ;;  %v3205_v57 = vld [vmem:[#allocation11 + $0x14c] sm:$0xf0] }
 0x1de   :  { %v2497_v2 = vor.u32 %v3101_v63, %v2494_v1  ;;  %v3142_v63 = vld [vmem:[#allocation10 + $0x54] sm:$0xf0] }
 0x1df   :  { %936 = vmatmul.bf16.vlgmr.msra.gmra.mxu2 %v734_v0  ;;  %964 = vmatmul.bf16.vlgmr.msrb.gmra.mxu0 %v734_v0  ;;  %v2493_v0 = vor.u32 %v3102_v62, %v2492_v61  ;;  %v2710_v61 = vld [vmem:[#allocation10 + $0xc8] sm:$0xf0]  ;;  %v2652_v62 = vld [vmem:[#allocation10 + $0x50] sm:$0xf] }
 0x1e0   :  { %1216 = vmatpush.bf16.msra.mxu0 %v2497_v2  ;;  %1450 = vmatpush.bf16.msra.mxu3 %v2733_v12  ;;  %v2653_v1 = vor.u32 %v3142_v63, %v2652_v62  ;;  %v3141_v2 = vld [vmem:[#allocation10 + $0x54] sm:$0xf]  ;;  %v3140_v12 = vld [vmem:[#allocation10 + $0x44] sm:$0xf0] }
 0x1e1   :  { %1188 = vmatpush.bf16.msrb.mxu2 %v2493_v0  ;;  %1478 = vmatpush.bf16.msrb.mxu1 %v2737_v16  ;;  %v2713_v0 = vor.u32 %v3155_v59, %v2710_v61  ;;  %v2657_v4 = vor.u32 %v3141_v2, %v2654_v3  ;;  %v2645_v14 = vor.u32 %v3140_v12, %v2644_v11  ;;  %v2980_v59 = vld [vmem:[#allocation11 + $0x1e0] sm:$0xf]  ;;  %v3223_v61 = vld [vmem:[#allocation11 + $0x1e4] sm:$0xf]  ;;  %v2982_v63 = vld [vmem:[#allocation11 + $0x1f0] sm:$0xf0] }
 0x1e2   :  { %v2649_v16 = vor.u32 %v3139_v13, %v2646_v15  ;;  %v2985_v2 = vor.u32 %v3223_v61, %v2982_v63  ;;  %v3219_v3 = vld [vmem:[#allocation11 + $0x1c4] sm:$0xf]  ;;  %v2948_v13 = vld [vmem:[#allocation11 + $0x1a0] sm:$0xf] }
 0x1e3   :  { %v3215_v15 = vld [vmem:[#allocation11 + $0x1a4] sm:$0xf] }
 0x1e4   :  { %1217 = vmatpush.bf16.msra.mxu0 %v2489_v8  ;;  %1451 = vmatpush.bf16.msra.mxu3 %v2725_v20  ;;  %v2693_v20 = vor.u32 %v3152_v18, %v2692_v17  ;;  %v2836_v17 = vld [vmem:[#allocation11 + $0xc0] sm:$0xf]  ;;  %v3189_v18 = vld [vmem:[#allocation11 + $0xcc] sm:$0xf0] }
 0x1e5   :  { %1189 = vmatpush.bf16.msrb.mxu2 %v2485_v6  ;;  %1479 = vmatpush.bf16.msrb.mxu1 %v2729_v24  ;;  %v3154_v6 = vld [vmem:[#allocation10 + $0xb4] sm:$0xf0]  ;;  %v2837_v19 = vor.u32 %v3189_v18, %v2836_v17  ;;  %v3199_v17 = vld [vmem:[#allocation11 + $0x124] sm:$0xf] }
 0x1e6   :  { %v2701_v8 = vor.u32 %v3154_v6, %v2700_v5  ;;  %v3138_v24 = vld [vmem:[#allocation10 + $0x34] sm:$0xf0]  ;;  %v2852_v5 = vld [vmem:[#allocation11 + $0xe0] sm:$0xf] }
 0x1e7   :  { %v2853_v11 = vor.u32 %v3193_v7, %v2852_v5 }
 0x1e8   :  { %1464 = vmatpush.bf16.msrb.mxu0 %v2673_v26  ;;  %1452 = vmatpush.bf16.msra.mxu3 %v2717_v31  ;;  %v2637_v26 = vor.u32 %v3138_v24, %v2636_v23  ;;  %v3149_v31 = vld [vmem:[#allocation10 + $0x94] sm:$0xf]  ;;  %v2932_v24 = vld [vmem:[#allocation11 + $0x180] sm:$0xf] }
 0x1e9   :  { %1436 = vmatpush.bf16.msra.mxu2 %v2669_v25  ;;  %1480 = vmatpush.bf16.msrb.mxu1 %v2721_v32  ;;  %v3137_v25 = vld [vmem:[#allocation10 + $0x34] sm:$0xf]  ;;  %v2685_v32 = vor.u32 %v3150_v30, %v2684_v29  ;;  %v3183_v29 = vld [vmem:[#allocation11 + $0xa4] sm:$0xf] }
 0x1ea   :  { %v2641_v28 = vor.u32 %v3137_v25, %v2638_v27  ;;  %v3213_v25 = vld [vmem:[#allocation11 + $0x18c] sm:$0xf0]  ;;  %v2820_v27 = vld [vmem:[#allocation11 + $0xa0] sm:$0xf] }
 0x1ec   :  { %1465 = vmatpush.bf16.msrb.mxu0 %v2665_v56  ;;  %1453 = vmatpush.bf16.msra.mxu3 %v2709_v60  ;;  %v3225_v60 = vld [vmem:[#allocation11 + $0x1ec] sm:$0xf0] }
 0x1ed   :  { %1437 = vmatpush.bf16.msra.mxu2 %v2661_v54  ;;  %1481 = vmatpush.bf16.msrb.mxu1 %v2713_v0  ;;  %v3132_v54 = vld [vmem:[#allocation10 + $0x4] sm:$0xf0]  ;;  %v2981_v62 = vor.u32 %v3225_v60, %v2980_v59  ;;  %v2964_v0 = vld [vmem:[#allocation11 + $0x1c0] sm:$0xf]  ;;  %v3203_v59 = vld [vmem:[#allocation11 + $0x144] sm:$0xf] }
 0x1ee   :  { %v2613_v56 = vor.u32 %v3132_v54, %v2612_v53  ;;  %v3175_v53 = vld [vmem:[#allocation11 + $0x64] sm:$0xf]  ;;  %v2790_v54 = vld [vmem:[#allocation11 + $0x70] sm:$0xf0] }
 0x1ef   :  { %v2902_v60 = vld [vmem:[#allocation11 + $0x150] sm:$0xf0]  ;;  %v2793_v63 = vor.u32 %v3175_v53, %v2790_v54  ;;  %v3163_v54 = vld [vmem:[#allocation11 + $0x4] sm:$0xf] }
 0x1f0   :  { %1466 = vmatpush.bf16.msrb.mxu0 %v2657_v4  ;;  %1454 = vmatpush.bf16.msra.mxu3 %v2701_v8  ;;  %v2966_v4 = vld [vmem:[#allocation11 + $0x1d0] sm:$0xf0]  ;;  %v3191_v8 = vld [vmem:[#allocation11 + $0xe4] sm:$0xf] }
 0x1f1   :  { %1438 = vmatpush.bf16.msra.mxu2 %v2653_v1  ;;  %1482 = vmatpush.bf16.msrb.mxu1 %v2705_v10  ;;  %v3221_v1 = vld [vmem:[#allocation11 + $0x1cc] sm:$0xf0]  ;;  %v2969_v10 = vor.u32 %v3219_v3, %v2966_v4  ;;  %v2857_v12 = vor.u32 %v3191_v8, %v2854_v9  ;;  %v2905_v4 = vor.u32 %v3203_v59, %v2902_v60  ;;  %v3192_v59 = vld [vmem:[#allocation11 + $0xec] sm:$0xf]  ;;  %v2862_v60 = vld [vmem:[#allocation11 + $0xf8] sm:$0xf0] }
 0x1f2   :  { %v2965_v6 = vor.u32 %v3221_v1, %v2964_v0 }
 0x1f4   :  { %1467 = vmatpush.bf16.msrb.mxu0 %v2649_v16  ;;  %1455 = vmatpush.bf16.msra.mxu3 %v2693_v20  ;;  %v2950_v16 = vld [vmem:[#allocation11 + $0x1b0] sm:$0xf0]  ;;  %v3187_v20 = vld [vmem:[#allocation11 + $0xc4] sm:$0xf] }
 0x1f5   :  { %1439 = vmatpush.bf16.msra.mxu2 %v2645_v14  ;;  %1483 = vmatpush.bf16.msrb.mxu1 %v2697_v22  ;;  %v3217_v14 = vld [vmem:[#allocation11 + $0x1ac] sm:$0xf0]  ;;  %v2841_v23 = vor.u32 %v3187_v20, %v2838_v21  ;;  %v2772_v21 = vld [vmem:[#allocation11 + $0x40] sm:$0xf] }
 0x1f6   :  { %v2949_v22 = vor.u32 %v3217_v14, %v2948_v13 }
 0x1f8   :  { %1468 = vmatpush.bf16.msrb.mxu0 %v2641_v28  ;;  %1456 = vmatpush.bf16.msra.mxu3 %v2685_v32  ;;  %v3185_v28 = vld [vmem:[#allocation11 + $0xac] sm:$0xf0]  ;;  %v2934_v32 = vld [vmem:[#allocation11 + $0x190] sm:$0xf0] }
 0x1f9   :  { %1440 = vmatpush.bf16.msra.mxu2 %v2637_v26  ;;  %v2953_v26 = vor.u32 %v3215_v15, %v2950_v16  ;;  %v2884_v15 = vld [vmem:[#allocation11 + $0x120] sm:$0xf]  ;;  %v3201_v16 = vld [vmem:[#allocation11 + $0x12c] sm:$0xf0] }
 0x1fa   :  { %v2885_v18 = vor.u32 %v3201_v16, %v2884_v15  ;;  %v2942_v15 = vld [vmem:[#allocation11 + $0x198] sm:$0xf0] }
 0x256   :  { %v979_v33 = vpop.f32.mrf.mxu1 }
 0x25c   :  { %v965_v34 = vpop.f32.mrf.mxu0  ;;  %v951_v35 = vpop.f32.mrf.mxu3 }
 0x25d   :  { %v980_v37 = vadd.f32 %v979_v33, %v965_v34  ;;  %v2686_v33 = vld [vmem:[#allocation10 + $0x98] sm:$0xf0] }
 0x25e   :  { %v981_v38 = vpop.f32.mrf.mxu1  ;;  %v2689_v34 = vor.u32 %v3149_v31, %v2686_v33  ;;  %v3211_v31 = vld [vmem:[#allocation11 + $0x184] sm:$0xf]  ;;  %v2822_v33 = vld [vmem:[#allocation11 + $0xb0] sm:$0xf0] }
 0x25f   :  { %v985_v41 = vmax.f32 %v980_v37, 0.0  ;;  %v3135_v37 = vld [vmem:[#allocation10 + $0x24] sm:$0xf] }
 0x260   :  { %1484 = vmatpush.bf16.msrb.mxu1 %v2689_v34  ;;  %v2821_v34 = vor.u32 %v3185_v28, %v2820_v27  ;;  %v3197_v27 = vld [vmem:[#allocation11 + $0x10c] sm:$0xf0] }
 0x262   :  { %v937_v36 = vpop.f32.mrf.mxu2 }
 0x263   :  { %v952_v43 = vadd.f32 %v951_v35, %v937_v36  ;;  %v2628_v35 = vld [vmem:[#allocation10 + $0x20] sm:$0xf]  ;;  %v3136_v36 = vld [vmem:[#allocation10 + $0x24] sm:$0xf0] }
 0x264   :  { %v967_v39 = vpop.f32.mrf.mxu0  ;;  %v953_v45 = vpop.f32.mrf.mxu3 }
 0x265   :  { %v982_v40 = vadd.f32 %v981_v38, %v967_v39  ;;  %v984_v48 = vmax.f32 %v952_v43, 0.0  ;;  %v2629_v38 = vor.u32 %v3136_v36, %v2628_v35  ;;  %v2630_v39 = vld [vmem:[#allocation10 + $0x28] sm:$0xf0]  ;;  %v3147_v43 = vld [vmem:[#allocation10 + $0x84] sm:$0xf]  ;;  %v2825_v35 = vor.u32 %v3183_v29, %v2822_v33 }
 0x266   :  { %v2804_v36 = vld [vmem:[#allocation11 + $0x80] sm:$0xf]  ;;  %v2988_v33 = vld [vmem:[#allocation11 + $0x1e8] sm:$0xf] }
 0x267   :  { %v987_v42 = vmax.f32 %v982_v40, 0.0  ;;  %v2633_v40 = vor.u32 %v3135_v37, %v2630_v39  ;;  %1441 = vmatpush.bf16.msra.mxu2 %v2629_v38  ;;  %v2933_v38 = vor.u32 %v3213_v25, %v2932_v24  ;;  %v3181_v39 = vld [vmem:[#allocation11 + $0x8c] sm:$0xf0]  ;;  %v2774_v25 = vld [vmem:[#allocation11 + $0x50] sm:$0xf0] }
 0x269   :  { %v989_v44 = vpack.c.bf16 %v987_v42, %v985_v41  ;;  %v2676_v41 = vld [vmem:[#allocation10 + $0x80] sm:$0xf]  ;;  %v3148_v42 = vld [vmem:[#allocation10 + $0x84] sm:$0xf0]  ;;  %1469 = vmatpush.bf16.msrb.mxu0 %v2633_v40  ;;  %v3179_v40 = vld [vmem:[#allocation11 + $0x84] sm:$0xf] }
 0x26a   :  { %v939_v46 = vpop.f32.mrf.mxu2 }
 0x26b   :  { %v954_v47 = vadd.f32 %v953_v45, %v939_v46  ;;  %1204 = vmatmul.bf16.vlgmr.msrb.gmra.mxu3 %v989_v44  ;;  %1232 = vmatmul.bf16.vlgmr.msra.gmra.mxu1 %v989_v44  ;;  %v2677_v44 = vor.u32 %v3148_v42, %v2676_v41  ;;  %v2678_v45 = vld [vmem:[#allocation10 + $0x88] sm:$0xf0]  ;;  %v2806_v41 = vld [vmem:[#allocation11 + $0x90] sm:$0xf0]  ;;  %v2937_v42 = vor.u32 %v3211_v31, %v2934_v32 }
 0x26c   :  { %v2681_v46 = vor.u32 %v3147_v43, %v2678_v45  ;;  %v2916_v43 = vld [vmem:[#allocation11 + $0x160] sm:$0xf]  ;;  %v3207_v45 = vld [vmem:[#allocation11 + $0x164] sm:$0xf]  ;;  %v2870_v31 = vld [vmem:[#allocation11 + $0x110] sm:$0xf0] }
 0x26d   :  { %v986_v49 = vmax.f32 %v954_v47, 0.0  ;;  %v2620_v47 = vld [vmem:[#allocation10 + $0x10] sm:$0xf]  ;;  %1457 = vmatpush.bf16.msra.mxu3 %v2677_v44 }
 0x26e   :  { %1485 = vmatpush.bf16.msrb.mxu1 %v2681_v46  ;;  %v3209_v44 = vld [vmem:[#allocation11 + $0x16c] sm:$0xf0]  ;;  %v2918_v46 = vld [vmem:[#allocation11 + $0x170] sm:$0xf0] }
 0x26f   :  { %v988_v50 = vpack.c.bf16 %v986_v49, %v984_v48  ;;  %v3134_v48 = vld [vmem:[#allocation10 + $0x14] sm:$0xf0]  ;;  %v3133_v49 = vld [vmem:[#allocation10 + $0x14] sm:$0xf]  ;;  %v2921_v55 = vor.u32 %v3207_v45, %v2918_v46  ;;  %v2972_v45 = vld [vmem:[#allocation11 + $0x1c8] sm:$0xf] }
 0x270   :  { %v2625_v52 = vor.u32 %v3133_v49, %v2622_v51  ;;  %v2788_v49 = vld [vmem:[#allocation11 + $0x60] sm:$0xf]  ;;  %v2917_v51 = vor.u32 %v3209_v44, %v2916_v43  ;;  %v2758_v43 = vld [vmem:[#allocation11 + $0x30] sm:$0xf0]  ;;  %v3222_v46 = vld [vmem:[#allocation11 + $0x1d4] sm:$0xf0] }
 0x271   :  { %1190 = vmatmul.bf16.vlgmr.msrb.gmra.mxu2 %v988_v50  ;;  %1218 = vmatmul.bf16.vlgmr.msra.gmra.mxu0 %v988_v50  ;;  %v2621_v50 = vor.u32 %v3134_v48, %v2620_v47  ;;  %v2805_v47 = vor.u32 %v3181_v39, %v2804_v36  ;;  %v2809_v48 = vor.u32 %v3179_v40, %v2806_v41  ;;  %v3169_v39 = vld [vmem:[#allocation11 + $0x2c] sm:$0xf0] }
 0x272   :  { %1470 = vmatpush.bf16.msrb.mxu0 %v2625_v52  ;;  %1896 = vmatpush.bf16.msrb.mxu3 %v2981_v62  ;;  %v3177_v52 = vld [vmem:[#allocation11 + $0x6c] sm:$0xf0] }
 0x273   :  { %1442 = vmatpush.bf16.msra.mxu2 %v2621_v50  ;;  %1924 = vmatpush.bf16.msra.mxu1 %v2985_v2  ;;  %v2789_v62 = vor.u32 %v3177_v52, %v2788_v49  ;;  %v2974_v49 = vld [vmem:[#allocation11 + $0x1d8] sm:$0xf0] }
 0x276   :  { %1471 = vmatpush.bf16.msrb.mxu0 %v2617_v58  ;;  %1897 = vmatpush.bf16.msrb.mxu3 %v2965_v6 }
 0x277   :  { %1443 = vmatpush.bf16.msra.mxu2 %v2613_v56  ;;  %1925 = vmatpush.bf16.msra.mxu1 %v2969_v10  ;;  %v2900_v56 = vld [vmem:[#allocation11 + $0x140] sm:$0xf] }
 0x278   :  { %v2901_v2 = vor.u32 %v3205_v57, %v2900_v56  ;;  %v2860_v56 = vld [vmem:[#allocation11 + $0xe8] sm:$0xf] }
 0x27a   :  { %1910 = vmatpush.bf16.msra.mxu0 %v2857_v12  ;;  %1898 = vmatpush.bf16.msrb.mxu3 %v2949_v22  ;;  %v3173_v22 = vld [vmem:[#allocation11 + $0x4c] sm:$0xf0] }
 0x27b   :  { %1882 = vmatpush.bf16.msrb.mxu2 %v2853_v11  ;;  %1926 = vmatpush.bf16.msra.mxu1 %v2953_v26  ;;  %v2773_v24 = vor.u32 %v3173_v22, %v2772_v21  ;;  %v2868_v26 = vld [vmem:[#allocation11 + $0x100] sm:$0xf]  ;;  %v2830_v21 = vld [vmem:[#allocation11 + $0xb8] sm:$0xf0] }
 0x27c   :  { %v2869_v29 = vor.u32 %v3197_v27, %v2868_v26  ;;  %v2926_v27 = vld [vmem:[#allocation11 + $0x178] sm:$0xf0] }
 0x27e   :  { %1911 = vmatpush.bf16.msra.mxu0 %v2841_v23  ;;  %1899 = vmatpush.bf16.msrb.mxu3 %v2933_v38  ;;  %v3171_v23 = vld [vmem:[#allocation11 + $0x44] sm:$0xf]  ;;  %v2756_v38 = vld [vmem:[#allocation11 + $0x20] sm:$0xf] }
 0x27f   :  { %1883 = vmatpush.bf16.msrb.mxu2 %v2837_v19  ;;  %1927 = vmatpush.bf16.msra.mxu1 %v2937_v42  ;;  %v2886_v19 = vld [vmem:[#allocation11 + $0x130] sm:$0xf0]  ;;  %v2777_v28 = vor.u32 %v3171_v23, %v2774_v25  ;;  %v2757_v41 = vor.u32 %v3169_v39, %v2756_v38  ;;  %v3167_v42 = vld [vmem:[#allocation11 + $0x24] sm:$0xf]  ;;  %v2924_v23 = vld [vmem:[#allocation11 + $0x168] sm:$0xf] }
 0x280   :  { %v2889_v20 = vor.u32 %v3199_v17, %v2886_v19  ;;  %v2761_v44 = vor.u32 %v3167_v42, %v2758_v43  ;;  %v2828_v17 = vld [vmem:[#allocation11 + $0xa8] sm:$0xf]  ;;  %v3184_v19 = vld [vmem:[#allocation11 + $0xac] sm:$0xf]  ;;  %v2910_v39 = vld [vmem:[#allocation11 + $0x158] sm:$0xf0] }
 0x281   :  { %v2833_v22 = vor.u32 %v3184_v19, %v2830_v21  ;;  %v3208_v25 = vld [vmem:[#allocation11 + $0x16c] sm:$0xf]  ;;  %v3178_v42 = vld [vmem:[#allocation11 + $0x74] sm:$0xf0] }
 0x282   :  { %1912 = vmatpush.bf16.msra.mxu0 %v2825_v35  ;;  %1900 = vmatpush.bf16.msrb.mxu3 %v2917_v51  ;;  %v3224_v35 = vld [vmem:[#allocation11 + $0x1ec] sm:$0xf]  ;;  %v3165_v51 = vld [vmem:[#allocation11 + $0xc] sm:$0xf0] }
 0x283   :  { %1884 = vmatpush.bf16.msrb.mxu2 %v2821_v34  ;;  %1928 = vmatpush.bf16.msra.mxu1 %v2921_v55  ;;  %v3226_v34 = vld [vmem:[#allocation11 + $0x1f4] sm:$0xf0]  ;;  %v2742_v55 = vld [vmem:[#allocation11 + $0x10] sm:$0xf0]  ;;  %v3176_v43 = vld [vmem:[#allocation11 + $0x6c] sm:$0xf] }
 0x284   :  { %v2989_v36 = vor.u32 %v3226_v34, %v2988_v33  ;;  %v2745_v57 = vor.u32 %v3163_v54, %v2742_v55  ;;  %v2814_v33 = vld [vmem:[#allocation11 + $0x98] sm:$0xf0] }
 0x286   :  { %1913 = vmatpush.bf16.msra.mxu0 %v2809_v48  ;;  %1901 = vmatpush.bf16.msrb.mxu3 %v2901_v2  ;;  %v2973_v48 = vor.u32 %v3222_v46, %v2972_v45  ;;  %v2798_v45 = vld [vmem:[#allocation11 + $0x78] sm:$0xf0] }
 0x287   :  { %1885 = vmatpush.bf16.msrb.mxu2 %v2805_v47  ;;  %1929 = vmatpush.bf16.msra.mxu1 %v2905_v4  ;;  %v3220_v47 = vld [vmem:[#allocation11 + $0x1cc] sm:$0xf]  ;;  %v2801_v46 = vor.u32 %v3176_v43, %v2798_v45 }
 0x288   :  { %v2977_v52 = vor.u32 %v3220_v47, %v2974_v49  ;;  %v2892_v47 = vld [vmem:[#allocation11 + $0x128] sm:$0xf]  ;;  %v3200_v49 = vld [vmem:[#allocation11 + $0x12c] sm:$0xf] }
 0x28a   :  { %1914 = vmatpush.bf16.msra.mxu0 %v2793_v63  ;;  %1902 = vmatpush.bf16.msrb.mxu3 %v2885_v18  ;;  %v2956_v63 = vld [vmem:[#allocation11 + $0x1a8] sm:$0xf]  ;;  %v3186_v18 = vld [vmem:[#allocation11 + $0xb4] sm:$0xf0] }
 0x28b   :  { %1886 = vmatpush.bf16.msrb.mxu2 %v2789_v62  ;;  %1930 = vmatpush.bf16.msra.mxu1 %v2889_v20  ;;  %v2865_v62 = vor.u32 %v3192_v59, %v2862_v60  ;;  %v2829_v20 = vor.u32 %v3186_v18, %v2828_v17  ;;  %v3198_v60 = vld [vmem:[#allocation11 + $0x114] sm:$0xf0] }
 0x28e   :  { %1915 = vmatpush.bf16.msra.mxu0 %v2777_v28  ;;  %1903 = vmatpush.bf16.msrb.mxu3 %v2869_v29  ;;  %v2929_v28 = vor.u32 %v3208_v25, %v2926_v27  ;;  %v2812_v29 = vld [vmem:[#allocation11 + $0x88] sm:$0xf] }
 0x28f   :  { %1887 = vmatpush.bf16.msrb.mxu2 %v2773_v24  ;;  %v3210_v24 = vld [vmem:[#allocation11 + $0x174] sm:$0xf0] }
 0x290   :  { %v2925_v26 = vor.u32 %v3210_v24, %v2924_v23 }
 0x292   :  { %1916 = vmatpush.bf16.msra.mxu0 %v2761_v44 }
 0x293   :  { %1888 = vmatpush.bf16.msrb.mxu2 %v2757_v41  ;;  %v2796_v41 = vld [vmem:[#allocation11 + $0x68] sm:$0xf] }
 0x294   :  { %v2797_v44 = vor.u32 %v3178_v42, %v2796_v41 }
 0x296   :  { %1917 = vmatpush.bf16.msra.mxu0 %v2745_v57  ;;  %v2782_v57 = vld [vmem:[#allocation11 + $0x58] sm:$0xf0] }
 0x2e8   :  { %v1233_v30 = vpop.f32.mrf.mxu1 }
 0x2ee   :  { %v1219_v37 = vpop.f32.mrf.mxu0  ;;  %v1205_v50 = vpop.f32.mrf.mxu3 }
 0x2ef   :  { %v1234_v61 = vadd.f32 %v1233_v30, %v1219_v37  ;;  %v3195_v30 = vld [vmem:[#allocation11 + $0x104] sm:$0xf]  ;;  %v2990_v37 = vld [vmem:[#allocation11 + $0x1f8] sm:$0xf0] }
 0x2f0   :  { %v1235_v0 = vpop.f32.mrf.mxu1  ;;  %v2873_v32 = vor.u32 %v3195_v30, %v2870_v31  ;;  %v2993_v40 = vor.u32 %v3224_v35, %v2990_v37  ;;  %v3182_v30 = vld [vmem:[#allocation11 + $0x94] sm:$0xf0]  ;;  %v3180_v31 = vld [vmem:[#allocation11 + $0x8c] sm:$0xf]  ;;  %v2908_v35 = vld [vmem:[#allocation11 + $0x148] sm:$0xf] }
 0x2f1   :  { %v1239_v5 = vmax.f32 %v1234_v61, 0.0  ;;  %v2817_v34 = vor.u32 %v3180_v31, %v2814_v33  ;;  %v3204_v37 = vld [vmem:[#allocation11 + $0x14c] sm:$0xf] }
 0x2f2   :  { %1931 = vmatpush.bf16.msra.mxu1 %v2873_v32  ;;  %v2813_v32 = vor.u32 %v3182_v30, %v2812_v29 }
 0x2f4   :  { %v1191_v58 = vpop.f32.mrf.mxu2 }
 0x2f5   :  { %v1206_v7 = vadd.f32 %v1205_v50, %v1191_v58  ;;  %v2740_v50 = vld [vmem:[#allocation11] sm:$0xf]  ;;  %v3194_v58 = vld [vmem:[#allocation11 + $0xf4] sm:$0xf0] }
 0x2f6   :  { %v1221_v1 = vpop.f32.mrf.mxu0  ;;  %v1207_v9 = vpop.f32.mrf.mxu3  ;;  %v2741_v53 = vor.u32 %v3165_v51, %v2740_v50  ;;  %v2861_v61 = vor.u32 %v3194_v58, %v2860_v56  ;;  %v2894_v51 = vld [vmem:[#allocation11 + $0x138] sm:$0xf0]  ;;  %v3172_v56 = vld [vmem:[#allocation11 + $0x4c] sm:$0xf]  ;;  %v2876_v58 = vld [vmem:[#allocation11 + $0x108] sm:$0xf] }
 0x2f7   :  { %v1236_v3 = vadd.f32 %v1235_v0, %v1221_v1  ;;  %v1238_v12 = vmax.f32 %v1206_v7, 0.0  ;;  %v3218_v0 = vld [vmem:[#allocation11 + $0x1b4] sm:$0xf0]  ;;  %v3216_v1 = vld [vmem:[#allocation11 + $0x1ac] sm:$0xf]  ;;  %v2897_v54 = vor.u32 %v3200_v49, %v2894_v51  ;;  %v2785_v59 = vor.u32 %v3172_v56, %v2782_v57  ;;  %v2006_v56 = vld [vmem:[%s3606_s1 + $0x20] sm:$0xff] }
 0x2f8   :  { %1889 = vmatpush.bf16.msrb.mxu2 %v2741_v53  ;;  %v2957_v2 = vor.u32 %v3218_v0, %v2956_v63  ;;  %v3188_v7 = vld [vmem:[#allocation11 + $0xcc] sm:$0xf]  ;;  %v3174_v53 = vld [vmem:[#allocation11 + $0x54] sm:$0xf0]  ;;  %v2877_v63 = vor.u32 %v3198_v60, %v2876_v58 }
 0x2f9   :  { %v1241_v6 = vmax.f32 %v1236_v3, 0.0  ;;  %v2958_v3 = vld [vmem:[#allocation11 + $0x1b8] sm:$0xf0] }
 0x2fa   :  { %v2961_v4 = vor.u32 %v3216_v1, %v2958_v3  ;;  %v2764_v1 = vld [vmem:[#allocation11 + $0x28] sm:$0xf]  ;;  %v3168_v3 = vld [vmem:[#allocation11 + $0x2c] sm:$0xf]  ;;  %v2005_v51 = vld [vmem:[%s3606_s1 + $0x18] sm:$0xff] }
 0x2fb   :  { %v1243_v8 = vpack.c.bf16 %v1241_v6, %v1239_v5  ;;  %v2844_v5 = vld [vmem:[#allocation11 + $0xc8] sm:$0xf]  ;;  %v3190_v6 = vld [vmem:[#allocation11 + $0xd4] sm:$0xf0] }
 0x2fc   :  { %v1193_v10 = vpop.f32.mrf.mxu2 }
 0x2fd   :  { %v1208_v11 = vadd.f32 %v1207_v9, %v1193_v10  ;;  %1458 = vmatmul.bf16.vlgmr.msra.gmra.mxu3 %v1243_v8  ;;  %1486 = vmatmul.bf16.vlgmr.msrb.gmra.mxu1 %v1243_v8  ;;  %v2845_v8 = vor.u32 %v3190_v6, %v2844_v5  ;;  %v2846_v9 = vld [vmem:[#allocation11 + $0xd8] sm:$0xf0] }
 0x2fe   :  { %1952 = vmatpush.bf16.msra.mxu3 %v2989_v36  ;;  %1980 = vmatpush.bf16.msrb.mxu1 %v2993_v40  ;;  %v2849_v10 = vor.u32 %v3188_v7, %v2846_v9  ;;  %v3206_v36 = vld [vmem:[#allocation11 + $0x154] sm:$0xf0]  ;;  %v2913_v40 = vor.u32 %v3204_v37, %v2910_v39 }
 0x2ff   :  { %v1240_v13 = vmax.f32 %v1208_v11, 0.0  ;;  %v2940_v11 = vld [vmem:[#allocation11 + $0x188] sm:$0xf]  ;;  %v2909_v38 = vor.u32 %v3206_v36, %v2908_v35  ;;  %v3166_v9 = vld [vmem:[#allocation11 + $0x14] sm:$0xf0] }
 0x301   :  { %v1242_v14 = vpack.c.bf16 %v1240_v13, %v1238_v12  ;;  %v3214_v12 = vld [vmem:[#allocation11 + $0x194] sm:$0xf0]  ;;  %v3212_v13 = vld [vmem:[#allocation11 + $0x18c] sm:$0xf] }
 0x302   :  { %1953 = vmatpush.bf16.msra.mxu3 %v2973_v48  ;;  %1981 = vmatpush.bf16.msrb.mxu1 %v2977_v52  ;;  %v2945_v16 = vor.u32 %v3212_v13, %v2942_v15  ;;  %v3202_v48 = vld [vmem:[#allocation11 + $0x134] sm:$0xf0]  ;;  %v2780_v52 = vld [vmem:[#allocation11 + $0x48] sm:$0xf]  ;;  %v2750_v13 = vld [vmem:[#allocation11 + $0x18] sm:$0xf0] }
 0x303   :  { %1444 = vmatmul.bf16.vlgmr.msra.gmra.mxu2 %v1242_v14  ;;  %1472 = vmatmul.bf16.vlgmr.msrb.gmra.mxu0 %v1242_v14  ;;  %v2941_v14 = vor.u32 %v3214_v12, %v2940_v11  ;;  %v2893_v50 = vor.u32 %v3202_v48, %v2892_v47  ;;  %v2781_v55 = vor.u32 %v3174_v53, %v2780_v52  ;;  %v2003_v47 = vld [vmem:[%s3606_s1 + $0x8] sm:$0xff]  ;;  %v2004_v53 = vld [vmem:[%s3606_s1 + $0x10] sm:$0xff] }
 0x304   :  { %1938 = vmatpush.bf16.msra.mxu2 %v2861_v61  ;;  %1966 = vmatpush.bf16.msrb.mxu0 %v2865_v62  ;;  %v3196_v61 = vld [vmem:[#allocation11 + $0x10c] sm:$0xf]  ;;  %v2878_v62 = vld [vmem:[#allocation11 + $0x118] sm:$0xf0] }
 0x305   :  { %v2881_v0 = vor.u32 %v3196_v61, %v2878_v62 }
 0x306   :  { %1954 = vmatpush.bf16.msra.mxu3 %v2957_v2  ;;  %1982 = vmatpush.bf16.msrb.mxu1 %v2961_v4  ;;  %v3170_v2 = vld [vmem:[#allocation11 + $0x34] sm:$0xf0]  ;;  %v2766_v4 = vld [vmem:[#allocation11 + $0x38] sm:$0xf0] }
 0x307   :  { %v2765_v5 = vor.u32 %v3170_v2, %v2764_v1  ;;  %v2769_v6 = vor.u32 %v3168_v3, %v2766_v4 }
 0x308   :  { %1939 = vmatpush.bf16.msra.mxu2 %v2845_v8  ;;  %1967 = vmatpush.bf16.msrb.mxu0 %v2849_v10  ;;  %v2748_v8 = vld [vmem:[#allocation11 + $0x8] sm:$0xf]  ;;  %v3164_v10 = vld [vmem:[#allocation11 + $0xc] sm:$0xf] }
 0x309   :  { %v2749_v12 = vor.u32 %v3166_v9, %v2748_v8  ;;  %v2008_v9 = vld [vmem:[%s3606_s1 + $0x30] sm:$0xff] }
 0x30a   :  { %1955 = vmatpush.bf16.msra.mxu3 %v2941_v14  ;;  %1983 = vmatpush.bf16.msrb.mxu1 %v2945_v16  ;;  %v2753_v14 = vor.u32 %v3164_v10, %v2750_v13 }
 0x30c   :  { %1940 = vmatpush.bf16.msra.mxu2 %v2829_v20  ;;  %1968 = vmatpush.bf16.msrb.mxu0 %v2833_v22 }
 0x30e   :  { %1956 = vmatpush.bf16.msra.mxu3 %v2925_v26  ;;  %1984 = vmatpush.bf16.msrb.mxu1 %v2929_v28 }
 0x310   :  { %1941 = vmatpush.bf16.msra.mxu2 %v2813_v32  ;;  %1969 = vmatpush.bf16.msrb.mxu0 %v2817_v34 }
 0x312   :  { %1957 = vmatpush.bf16.msra.mxu3 %v2909_v38  ;;  %1985 = vmatpush.bf16.msrb.mxu1 %v2913_v40 }
 0x314   :  { %1942 = vmatpush.bf16.msra.mxu2 %v2797_v44  ;;  %1970 = vmatpush.bf16.msrb.mxu0 %v2801_v46  ;;  %v2002_v44 = vld [vmem:[%s3606_s1] sm:$0xff] }
 0x316   :  { %1958 = vmatpush.bf16.msra.mxu3 %v2893_v50  ;;  %1986 = vmatpush.bf16.msrb.mxu1 %v2897_v54 }
 0x318   :  { %1943 = vmatpush.bf16.msra.mxu2 %v2781_v55  ;;  %1971 = vmatpush.bf16.msrb.mxu0 %v2785_v59 }
 0x31a   :  { %1959 = vmatpush.bf16.msra.mxu3 %v2877_v63  ;;  %1987 = vmatpush.bf16.msrb.mxu1 %v2881_v0  ;;  %v2007_v63 = vld [vmem:[%s3606_s1 + $0x28] sm:$0xff] }
 0x31c   :  { %1944 = vmatpush.bf16.msra.mxu2 %v2765_v5  ;;  %1972 = vmatpush.bf16.msrb.mxu0 %v2769_v6 }
 0x320   :  { %1945 = vmatpush.bf16.msra.mxu2 %v2749_v12  ;;  %1973 = vmatpush.bf16.msrb.mxu0 %v2753_v14 }
 0x37a   :  { %v1487_v7 = vpop.f32.mrf.mxu1 }
 0x380   :  { %v1473_v11 = vpop.f32.mrf.mxu0  ;;  %v1459_v15 = vpop.f32.mrf.mxu3 }
 0x381   :  { %v1488_v17 = vadd.f32 %v1487_v7, %v1473_v11  ;;  %v2009_v7 = vld [vmem:[%s3606_s1 + $0x38] sm:$0xff] }
 0x382   :  { %v1489_v18 = vpop.f32.mrf.mxu1 }
 0x383   :  { %v1493_v21 = vmax.f32 %v1488_v17, 0.0 }
 0x386   :  { %v1445_v16 = vpop.f32.mrf.mxu2 }
 0x387   :  { %v1460_v23 = vadd.f32 %v1459_v15, %v1445_v16 }
 0x388   :  { %v1475_v19 = vpop.f32.mrf.mxu0  ;;  %v1461_v25 = vpop.f32.mrf.mxu3 }
 0x389   :  { %v1490_v20 = vadd.f32 %v1489_v18, %v1475_v19  ;;  %v1492_v28 = vmax.f32 %v1460_v23, 0.0 }
 0x38b   :  { %v1495_v22 = vmax.f32 %v1490_v20, 0.0 }
 0x38d   :  { %v1497_v24 = vpack.c.bf16 %v1495_v22, %v1493_v21 }
 0x38e   :  { %v1447_v26 = vpop.f32.mrf.mxu2 }
 0x38f   :  { %v1462_v27 = vadd.f32 %v1461_v25, %v1447_v26  ;;  %1904 = vmatmul.bf16.vlgmr.msrb.gmra.mxu3 %v1497_v24  ;;  %1932 = vmatmul.bf16.vlgmr.msra.gmra.mxu1 %v1497_v24 }
 0x391   :  { %v1494_v29 = vmax.f32 %v1462_v27, 0.0 }
 0x393   :  { %v1496_v30 = vpack.c.bf16 %v1494_v29, %v1492_v28 }
 0x395   :  { %1890 = vmatmul.bf16.vlgmr.msrb.gmra.mxu2 %v1496_v30  ;;  %1918 = vmatmul.bf16.vlgmr.msra.gmra.mxu0 %v1496_v30 }
 0x39f   :  { %1960 = vmatmul.bf16.vlgmr.msra.gmra.mxu3 %v1497_v24  ;;  %1988 = vmatmul.bf16.vlgmr.msrb.gmra.mxu1 %v1497_v24 }
 0x3a5   :  { %1946 = vmatmul.bf16.vlgmr.msra.gmra.mxu2 %v1496_v30  ;;  %1974 = vmatmul.bf16.vlgmr.msrb.gmra.mxu0 %v1496_v30 }
 0x40c   :  { %v1933_v31 = vpop.f32.mrf.mxu1 }
 0x412   :  { %v1905_v32 = vpop.f32.mrf.mxu3  ;;  %v1919_v33 = vpop.f32.mrf.mxu0 }
 0x413   :  { %v1934_v34 = vadd.f32 %v1933_v31, %v1919_v33 }
 0x414   :  { %v1935_v35 = vpop.f32.mrf.mxu1 }
 0x415   :  { %1995 = vst [vmem:[#allocation13 + $0x8] sm:$0xff] %v1934_v34  ;;  %v2011_v50 = vsub.f32 %v2003_v47, %v1934_v34 }
 0x417   :  { %v2019_v59 = vmul.f32 %v2011_v50, %v2011_v50 }
 0x418   :  { %v1891_v36 = vpop.f32.mrf.mxu2 }
 0x419   :  { %v1906_v37 = vadd.f32 %v1905_v32, %v1891_v36 }
 0x41a   :  { %v1921_v38 = vpop.f32.mrf.mxu0  ;;  %v1907_v40 = vpop.f32.mrf.mxu3 }
 0x41b   :  { %1994 = vst [vmem:[#allocation13] sm:$0xff] %v1906_v37  ;;  %v1936_v39 = vadd.f32 %v1935_v35, %v1921_v38  ;;  %v2010_v48 = vsub.f32 %v2002_v44, %v1906_v37 }
 0x41c   :  { %v1989_v41 = vpop.f32.mrf.mxu1 }
 0x41d   :  { %1999 = vst [vmem:[#allocation13 + $0x28] sm:$0xff] %v1936_v39  ;;  %v2018_v54 = vmul.f32 %v2010_v48, %v2010_v48  ;;  %v2015_v3 = vsub.f32 %v2007_v63, %v1936_v39 }
 0x41f   :  { %v2026_v0 = vadd.f32 %v2019_v59, %v2018_v54  ;;  %v2023_v13 = vmul.f32 %v2015_v3, %v2015_v3 }
 0x420   :  { %v1893_v42 = vpop.f32.mrf.mxu2 }
 0x421   :  { %v1908_v43 = vadd.f32 %v1907_v40, %v1893_v42 }
 0x422   :  { %v1975_v45 = vpop.f32.mrf.mxu0  ;;  %v1961_v49 = vpop.f32.mrf.mxu3 }
 0x423   :  { %1998 = vst [vmem:[#allocation13 + $0x20] sm:$0xff] %v1908_v43  ;;  %v1990_v46 = vadd.f32 %v1989_v41, %v1975_v45  ;;  %v2014_v1 = vsub.f32 %v2006_v56, %v1908_v43 }
 0x424   :  { %v1991_v57 = vpop.f32.mrf.mxu1 }
 0x425   :  { %1997 = vst [vmem:[#allocation13 + $0x18] sm:$0xff] %v1990_v46  ;;  %v2013_v60 = vsub.f32 %v2005_v51, %v1990_v46  ;;  %v2022_v10 = vmul.f32 %v2014_v1, %v2014_v1 }
 0x427   :  { %v2021_v4 = vmul.f32 %v2013_v60, %v2013_v60  ;;  %v2027_v16 = vadd.f32 %v2023_v13, %v2022_v10 }
 0x428   :  { %v1947_v52 = vpop.f32.mrf.mxu2 }
 0x429   :  { %v1962_v55 = vadd.f32 %v1961_v49, %v1947_v52 }
 0x42a   :  { %v1977_v58 = vpop.f32.mrf.mxu0  ;;  %v1963_v6 = vpop.f32.mrf.mxu3 }
 0x42b   :  { %1996 = vst [vmem:[#allocation13 + $0x10] sm:$0xff] %v1962_v55  ;;  %v2012_v61 = vsub.f32 %v2004_v53, %v1962_v55  ;;  %v1992_v62 = vadd.f32 %v1991_v57, %v1977_v58 }
 0x42d   :  { %v2020_v2 = vmul.f32 %v2012_v61, %v2012_v61  ;;  %2001 = vst [vmem:[#allocation13 + $0x38] sm:$0xff] %v1992_v62  ;;  %v2017_v14 = vsub.f32 %v2009_v7, %v1992_v62 }
 0x42f   :  { %v2028_v5 = vadd.f32 %v2026_v0, %v2020_v2  ;;  %v2025_v18 = vmul.f32 %v2017_v14, %v2017_v14 }
 0x430   :  { %v1949_v8 = vpop.f32.mrf.mxu2 }
 0x431   :  { %v2030_v11 = vadd.f32 %v2028_v5, %v2021_v4  ;;  %v1964_v12 = vadd.f32 %v1963_v6, %v1949_v8 }
 0x433   :  { %2032 = vst [vmem:[%s3615_s10] sm:$0xff] %v2030_v11  ;;  %v2016_v15 = vsub.f32 %v2008_v9, %v1964_v12 }
 0x434   :  { %2000 = vst [vmem:[#allocation13 + $0x30] sm:$0xff] %v1964_v12 }
 0x435   :  { %v2024_v17 = vmul.f32 %v2016_v15, %v2016_v15  ;;  %2046 = dma.vmem_to_hbm [thread:$0]  %s2039_s16, 1024, %s2041_s19, [#allocation4], %s3429_s21, %s3429_s21, %s3430_s22  }
 0x437   :  { %v2029_v19 = vadd.f32 %v2027_v16, %v2024_v17 }
 0x439   :  { %v2031_v20 = vadd.f32 %v2029_v19, %v2025_v18 }
 0x43b   :  { %2033 = vst [vmem:[%s3615_s10 + $0x8] sm:$0xff] %v2031_v20 }
 0x43c   :  { %3416 = dma.done.wait [#allocation4], 1024  }
 0x43d   :  { %3417 = vsyncadd [#allocation4], 4294966272 }
 0x43e   :  { %2055 = vsyncpa [#allocation3], 1 }
 0x43f   :  { %2056 = vsyncpa [#allocation6], 1 }
 0x440   :  { %2057 = vsyncpa [#allocation9], 1 }
 0x441   :  { %2058 = vsyncpa [#allocation12], 1 }
 0x442   :  { %2059 = vsyncpa [#allocation4], 1 }

</bundles_post_ra>
